<compile_context>
chip_gen: v5e
topology: v5e:2x2
jax: 0.10.0
libtpu: 0.0.40
codegen_flags: <defaults>
</compile_context>

<pallas_src>
import functools

import jax
import jax.numpy as jnp
from jax.experimental import pallas as pl
from jax.experimental.pallas import tpu as pltpu


# ---------------------------------------------------------------------------
# Model hyper-parameters (small, consistent with the module's __init__)
# ---------------------------------------------------------------------------
CHANNELS = 8           # `channels`  (must be even)
HALF = CHANNELS // 2   # `half_channels`
HIDDEN = 32            # `hidden_channels`
KSIZE = 3              # `kernel_size`
DIL_RATE = 2           # `dilation_rate`
N_LAYERS = 4           # `n_layers`
GIN = 16               # `gin_channels`
B = 2                  # batch
T = 16                 # time steps
MAX_PAD = (DIL_RATE ** (N_LAYERS - 1)) * (KSIZE - 1) // 2   # = 8
# p_dropout = 0 (identity), mean_only = False, reverse = False


def _coupling_kernel(
    x_ref, mask_ref, g_ref,
    wpc_ref, bpc_ref,              # fused [cond | pre] 1x1 conv
    win_ref, bin_ref,              # in_layers (fused 3-tap)
    wrs_ref, brs_ref,              # res/skip layers 0..L-2
    wrsl_ref, brsl_ref,            # last res/skip layer (res half only)
    wpost_ref, bpost_ref,          # post 1x1 conv (f32)
    y_ref, ld_ref,
    h_halo_ref,                    # VMEM scratch (B, T+2*max_pad, H) f32
    *, half, hidden, ksize, dil_rate, n_layers, t_len, batch, max_pad,
):
    bt = batch * t_len
    bf16 = jnp.bfloat16
    cond_width = 2 * hidden * n_layers

    x = x_ref[...]                          # (BT, C)  f32
    mask = mask_ref[...]                    # (BT, 1)  f32
    # Hoisted broadcast: JAX does not CSE broadcast_in_dim, reuse everywhere.
    mask_h = jnp.broadcast_to(mask, (bt, hidden))

    x0 = x[:, :half]                        # (BT, half) f32 (kept for passthrough)
    x1 = x[:, half:]                        # (BT, half)

    # ------------------------------------------------------------------
    # Fused pre + cond 1x1 convs: one (BT, half+gin) @ (half+gin, 2HL+H)
    # block-diagonal matmul.  Columns ordered [cond | pre] so both result
    # slices are 128-lane aligned.
    # ------------------------------------------------------------------
    xg = jnp.concatenate([x0, g_ref[...]], axis=-1).astype(bf16)   # (BT, half+gin)
    hg = (jnp.dot(xg, wpc_ref[...], preferred_element_type=jnp.float32)
          + bpc_ref[...])                                          # (BT, 2HL+H) f32
    g_all = hg[:, :cond_width]                                     # (BT, 2HL)
    h = hg[:, cond_width:] * mask_h                                # (BT, H)

    # Zero the halo scratch once; only the interior is rewritten each layer,
    # so the halos stay zero (== the reference's zero time-padding).
    h_halo_ref[...] = jnp.zeros_like(h_halo_ref)

    out = jnp.zeros((bt, hidden), jnp.float32)

    # ------------------------------------------------------------------
    # NonCausalWaveNet stack: per layer one fused K=3H matmul (3 taps read as
    # static slices of the zero-haloed scratch), gated activation, and one
    # res/skip 1x1 conv.
    # ------------------------------------------------------------------
    for i in range(n_layers):
        dil = dil_rate ** i
        pad = dil * (ksize - 1) // 2

        # Write masked h into the zero-haloed scratch (per-batch segments keep
        # their own halo, so taps never leak across batch boundaries).
        h_halo_ref[:, max_pad:max_pad + t_len, :] = h.reshape(batch, t_len, hidden)

        taps = []
        for j in range(ksize):
            off = j * dil - pad
            if off == 0:
                taps.append(h)                                     # middle tap
            else:
                s = max_pad + off                                  # static start
                taps.append(
                    h_halo_ref[:, s:s + t_len, :].reshape(bt, hidden))
        h_cat = jnp.concatenate(taps, axis=-1).astype(bf16)        # (BT, 3H)

        z = (jnp.dot(h_cat, win_ref[i], preferred_element_type=jnp.float32)
             + bin_ref[i])                                         # (BT, 2H) f32
        # p_dropout == 0 -> identity

        # fused_add_tanh_sigmoid_multiply with this layer's cond slice
        z = z + g_all[:, i * 2 * hidden:(i + 1) * 2 * hidden]
        acts = jnp.tanh(z[:, :hidden]) * jax.nn.sigmoid(z[:, hidden:])  # (BT, H)

        if i < n_layers - 1:
            rs = (jnp.dot(acts.astype(bf16), wrs_ref[i],
                          preferred_element_type=jnp.float32)
                  + brs_ref[i])                                    # (BT, 2H)
            h = (h + rs[:, :hidden]) * mask_h
            out = out + rs[:, hidden:]
        else:
            # Last layer: weight pre-sliced to (H, H) on host, skip half only.
            rs = (jnp.dot(acts.astype(bf16), wrsl_ref[...],
                          preferred_element_type=jnp.float32)
                  + brsl_ref[...])                                 # (BT, H)
            out = out + rs

    out = out * mask_h

    # ------------------------------------------------------------------
    # post: 1x1 conv -> [m, logs].  Kept fully f32 to preserve logdet
    # accuracy.  # TODO(synk): on v7x this could take bf16 inputs if the
    # logdet tolerance is re-validated.
    # ------------------------------------------------------------------
    stats = (jnp.dot(out, wpost_ref[...], preferred_element_type=jnp.float32)
             + bpost_ref[...]) * mask                              # (BT, 2*half)
    m = stats[:, :half]
    logs = stats[:, half:]

    # forward (reverse=False) affine coupling
    x1_new = m + x1 * jnp.exp(logs) * mask
    # Two partial-lane stores instead of a lane concat.
    y_ref[:, :half] = x0
    y_ref[:, half:] = x1_new

    # logdet: one lane reduction, then per-batch static-segment sublane sums.
    row_sum = jnp.sum(logs, axis=1, keepdims=True)                 # (BT, 1)
    parts = [
        jnp.sum(row_sum[b_i * t_len:(b_i + 1) * t_len, :], axis=0, keepdims=True)
        for b_i in range(batch)
    ]                                                              # B x (1, 1)
    ld_ref[...] = jnp.concatenate(parts, axis=0)                   # (B, 1)


def residual_coupling_forward(x, x_mask, g, params):
    """x: (B, T, C), x_mask: (B, T, 1), g: (B, T, GIN) -> (y, logdet)."""
    (wpre, bpre, wcond, bcond, win, bin_, wrs, brs, wpost, bpost) = params
    b, t_len, c = x.shape
    gin = g.shape[-1]
    bt = b * t_len
    bf16 = jnp.bfloat16

    # ---- Host-side weight prep (done once; bf16 for MXU inputs) ----------
    cond_width = 2 * HIDDEN * N_LAYERS
    # Fused block-diagonal [cond | pre] weight over input [x0 | g].
    w_pc = jnp.zeros((HALF + gin, cond_width + HIDDEN), jnp.float32)
    w_pc = w_pc.at[HALF:, :cond_width].set(wcond)     # g    -> cond columns
    w_pc = w_pc.at[:HALF, cond_width:].set(wpre)      # x0   -> pre columns
    w_pc = w_pc.astype(bf16)
    b_pc = jnp.concatenate([bcond, bpre], axis=-1)    # (1, cond_width + H) f32

    # Fuse per-tap in_layer weights: (L*K, H, 2H) -> (L, K*H, 2H) so each
    # layer's dilated conv is a single (BT, 3H) @ (3H, 2H) matmul.
    win_fused = win.reshape(N_LAYERS, KSIZE * HIDDEN, 2 * HIDDEN).astype(bf16)

    # res/skip: layers 0..L-2 keep both halves; last layer keeps only the
    # res->skip half that is actually consumed.
    wrs_main = wrs[:N_LAYERS - 1].astype(bf16)         # (L-1, H, 2H)
    brs_main = brs[:N_LAYERS - 1]                      # (L-1, 1, 2H) f32
    wrs_last = wrs[N_LAYERS - 1, :, :HIDDEN].astype(bf16)   # (H, H)
    brs_last = brs[N_LAYERS - 1, :, :HIDDEN]                # (1, H) f32

    # Flatten batch into the sublane axis: one grid step handles everything.
    x2 = x.reshape(bt, c)
    m2 = x_mask.reshape(bt, 1)
    g2 = g.reshape(bt, gin)

    kernel = functools.partial(
        _coupling_kernel,
        half=HALF, hidden=HIDDEN, ksize=KSIZE, dil_rate=DIL_RATE,
        n_layers=N_LAYERS, t_len=t_len, batch=b, max_pad=MAX_PAD,
    )

    def full_spec(a):
        zeros = (0,) * a.ndim
        return pl.BlockSpec(a.shape, lambda i, _z=zeros: _z)

    grid_spec = pltpu.PrefetchScalarGridSpec(
        num_scalar_prefetch=0,
        grid=(1,),
        in_specs=[
            full_spec(x2), full_spec(m2), full_spec(g2),
            full_spec(w_pc), full_spec(b_pc),
            full_spec(win_fused), full_spec(bin_),
            full_spec(wrs_main), full_spec(brs_main),
            full_spec(wrs_last), full_spec(brs_last),
            full_spec(wpost), full_spec(bpost),
        ],
        out_specs=[
            pl.BlockSpec((bt, c), lambda i: (0, 0)),   # y (flattened)
            pl.BlockSpec((b, 1), lambda i: (0, 0)),    # per-batch logdet
        ],
        scratch_shapes=[
            pltpu.VMEM((b, t_len + 2 * MAX_PAD, HIDDEN), jnp.float32),
        ],
    )

    y2, ld = pl.pallas_call(
        kernel,
        out_shape=(
            jax.ShapeDtypeStruct((bt, c), jnp.float32),
            jax.ShapeDtypeStruct((b, 1), jnp.float32),
        ),
        grid_spec=grid_spec,
        compiler_params=pltpu.CompilerParams(
            dimension_semantics=("arbitrary",)),
    )(x2, m2, g2, w_pc, b_pc, win_fused, bin_, wrs_main, brs_main,
      wrs_last, brs_last, wpost, bpost)

    y = y2.reshape(b, t_len, c)
    logdet = ld[:, 0]
    # TODO(synk): at real PortaSpeech sizes (T in the hundreds/thousands) add a
    # BT grid in whole-T multiples marked "parallel" (v7x has 2 TensorCores and
    # only 64 MiB VMEM) and carry halo rows per block for the dilated taps.
    return y, logdet


# ---------------------------------------------------------------------------
# Pure-JAX f32 reference (same layout) for a sanity check
# ---------------------------------------------------------------------------
def reference_forward(x, x_mask, g, params):
    (wpre, bpre, wcond, bcond, win, bin_, wrs, brs, wpost, bpost) = params
    t_len = x.shape[1]
    x0, x1 = x[..., :HALF], x[..., HALF:]
    h = (x0 @ wpre + bpre) * x_mask
    g_all = g @ wcond + bcond
    out = jnp.zeros_like(h)
    for i in range(N_LAYERS):
        dil = DIL_RATE ** i
        pad = dil * (KSIZE - 1) // 2
        hp = jnp.pad(h, ((0, 0), (pad, pad), (0, 0)))
        z = jnp.zeros((x.shape[0], t_len, 2 * HIDDEN), jnp.float32)
        for j in range(KSIZE):
            z = z + hp[:, j * dil:j * dil + t_len, :] @ win[i * KSIZE + j]
        z = z + bin_[i] + g_all[..., i * 2 * HIDDEN:(i + 1) * 2 * HIDDEN]
        acts = jnp.tanh(z[..., :HIDDEN]) * jax.nn.sigmoid(z[..., HIDDEN:])
        rs = acts @ wrs[i] + brs[i]
        if i < N_LAYERS - 1:
            h = (h + rs[..., :HIDDEN]) * x_mask
            out = out + rs[..., HIDDEN:]
        else:
            out = out + rs[..., :HIDDEN]
    out = out * x_mask
    stats = (out @ wpost + bpost) * x_mask
    m, logs = stats[..., :HALF], stats[..., HALF:]
    x1n = m + x1 * jnp.exp(logs) * x_mask
    y = jnp.concatenate([x0, x1n], axis=-1)
    logdet = jnp.sum(logs, axis=(1, 2))
    return y, logdet


def make_params(key):
    ks = jax.random.split(key, 12)
    scale = 0.1
    wpre = scale * jax.random.normal(ks[0], (HALF, HIDDEN), jnp.float32)
    bpre = scale * jax.random.normal(ks[1], (1, HIDDEN), jnp.float32)
    # weight_norm(cond_layer) forward == a plain 1x1 conv with the effective weight
    wcond = scale * jax.random.normal(ks[2], (GIN, 2 * HIDDEN * N_LAYERS), jnp.float32)
    bcond = scale * jax.random.normal(ks[3], (1, 2 * HIDDEN * N_LAYERS), jnp.float32)
    # in_layers: stacked (L*K, H, 2H)  (Conv1d weight (2H, H, K) transposed per-tap)
    win = scale * jax.random.normal(ks[4], (N_LAYERS * KSIZE, HIDDEN, 2 * HIDDEN), jnp.float32)
    bin_ = scale * jax.random.normal(ks[5], (N_LAYERS, 1, 2 * HIDDEN), jnp.float32)
    # res_skip_layers: stacked (L, H, 2H); last layer only uses the first H columns
    wrs = scale * jax.random.normal(ks[6], (N_LAYERS, HIDDEN, 2 * HIDDEN), jnp.float32)
    brs = scale * jax.random.normal(ks[7], (N_LAYERS, 1, 2 * HIDDEN), jnp.float32)
    # post: the PyTorch module zero-inits this (training detail); use small random
    # values here so the kernel exercises non-trivial compute.
    wpost = scale * jax.random.normal(ks[8], (HIDDEN, 2 * HALF), jnp.float32)
    bpost = scale * jax.random.normal(ks[9], (1, 2 * HALF), jnp.float32)
    return (wpre, bpre, wcond, bcond, win, bin_, wrs, brs, wpost, bpost)


if __name__ == "__main__":
    key = jax.random.PRNGKey(0)
    k_x, k_g, k_p = jax.random.split(key, 3)

    x = jax.random.normal(k_x, (B, T, CHANNELS), jnp.float32)
    g = jax.random.normal(k_g, (B, T, GIN), jnp.float32)
    # mask: second batch element has the last 4 frames padded out
    mask = jnp.ones((B, T, 1), jnp.float32)
    mask = mask.at[1, T - 4:, 0].set(0.0)
    params = make_params(k_p)

    # Reference first (f32 everywhere).
    y_ref, logdet_ref = reference_forward(x, mask, g, params)

    y, logdet = residual_coupling_forward(x, mask, g, params)
    jax.block_until_ready((y, logdet))

    assert y.shape == (B, T, CHANNELS) and logdet.shape == (B,)
    assert jnp.all(jnp.isfinite(y)) and jnp.all(jnp.isfinite(logdet))
    # Kernel uses bf16 MXU inputs (f32 accumulation); tolerances account for
    # the bf16 rounding vs. the pure-f32 reference.
    assert jnp.max(jnp.abs(y - y_ref)) < 3e-2, float(jnp.max(jnp.abs(y - y_ref)))
    assert jnp.max(jnp.abs(logdet - logdet_ref)) < 1e-1, float(
        jnp.max(jnp.abs(logdet - logdet_ref)))

    # TODO(synk): reverse=False path only; the `reverse=True` branch is the same
    # kernel with x1 = (x1 - m) * exp(-logs) * mask and no logdet output.
    print("KERNEL_OK")
</pallas_src>

<mosaic_0001>
module attributes {stable_mosaic.version = 11 : i64} {
  func.func @_coupling_kernel(%arg0: i32, %arg1: memref<32x8xf32, #tpu.memory_space<vmem>>, %arg2: memref<32x1xf32, #tpu.memory_space<vmem>>, %arg3: memref<32x16xf32, #tpu.memory_space<vmem>>, %arg4: memref<20x288xbf16, #tpu.memory_space<vmem>>, %arg5: memref<1x288xf32, #tpu.memory_space<vmem>>, %arg6: memref<4x96x64xbf16, #tpu.memory_space<vmem>>, %arg7: memref<4x1x64xf32, #tpu.memory_space<vmem>>, %arg8: memref<3x32x64xbf16, #tpu.memory_space<vmem>>, %arg9: memref<3x1x64xf32, #tpu.memory_space<vmem>>, %arg10: memref<32x32xbf16, #tpu.memory_space<vmem>>, %arg11: memref<1x32xf32, #tpu.memory_space<vmem>>, %arg12: memref<32x8xf32, #tpu.memory_space<vmem>>, %arg13: memref<1x8xf32, #tpu.memory_space<vmem>>, %arg14: memref<32x8xf32, #tpu.memory_space<vmem>>, %arg15: memref<2x1xf32, #tpu.memory_space<vmem>>, %arg16: memref<2x32x32xf32, #tpu.memory_space<vmem>>) attributes {dimension_semantics = [#tpu.dimension_semantics<arbitrary>], iteration_bounds = array<i64: 1>, scalar_prefetch = 0 : i64, scratch_operands = 1 : i64, tpu.core_type = #tpu.core_type<tc>, window_params = [{pipeline_mode = #tpu.pipeline_mode<synchronous>, transform_indices = @transform_0, window_bounds = array<i64: 32, 8>}, {pipeline_mode = #tpu.pipeline_mode<synchronous>, transform_indices = @transform_1, window_bounds = array<i64: 32, 1>}, {pipeline_mode = #tpu.pipeline_mode<synchronous>, transform_indices = @transform_2, window_bounds = array<i64: 32, 16>}, {pipeline_mode = #tpu.pipeline_mode<synchronous>, transform_indices = @transform_3, window_bounds = array<i64: 20, 288>}, {pipeline_mode = #tpu.pipeline_mode<synchronous>, transform_indices = @transform_4, window_bounds = array<i64: 1, 288>}, {pipeline_mode = #tpu.pipeline_mode<synchronous>, transform_indices = @transform_5, window_bounds = array<i64: 4, 96, 64>}, {pipeline_mode = #tpu.pipeline_mode<synchronous>, transform_indices = @transform_6, window_bounds = array<i64: 4, 1, 64>}, {pipeline_mode = #tpu.pipeline_mode<synchronous>, transform_indices = @transform_7, window_bounds = array<i64: 3, 32, 64>}, {pipeline_mode = #tpu.pipeline_mode<synchronous>, transform_indices = @transform_8, window_bounds = array<i64: 3, 1, 64>}, {pipeline_mode = #tpu.pipeline_mode<synchronous>, transform_indices = @transform_9, window_bounds = array<i64: 32, 32>}, {pipeline_mode = #tpu.pipeline_mode<synchronous>, transform_indices = @transform_10, window_bounds = array<i64: 1, 32>}, {pipeline_mode = #tpu.pipeline_mode<synchronous>, transform_indices = @transform_11, window_bounds = array<i64: 32, 8>}, {pipeline_mode = #tpu.pipeline_mode<synchronous>, transform_indices = @transform_12, window_bounds = array<i64: 1, 8>}, {pipeline_mode = #tpu.pipeline_mode<synchronous>, transform_indices = @transform_13, window_bounds = array<i64: 32, 8>}, {pipeline_mode = #tpu.pipeline_mode<synchronous>, transform_indices = @transform_14, window_bounds = array<i64: 2, 1>}]} {
    %c0 = arith.constant 0 : index
    %c0_0 = arith.constant 0 : index
    %0 = vector.load %arg1[%c0, %c0_0] : memref<32x8xf32, #tpu.memory_space<vmem>>, vector<32x8xf32>
    %c0_1 = arith.constant 0 : index
    %c0_2 = arith.constant 0 : index
    %1 = vector.load %arg2[%c0_1, %c0_2] : memref<32x1xf32, #tpu.memory_space<vmem>>, vector<32x1xf32>
    %2 = vector.shape_cast %1 : vector<32x1xf32> to vector<32x1xf32>
    %3 = vector.broadcast %2 : vector<32x1xf32> to vector<32x32xf32>
    %4 = vector.extract_strided_slice %0 {offsets = [0, 0], sizes = [32, 4], strides = [1, 1]} : vector<32x8xf32> to vector<32x4xf32>
    %5 = vector.extract_strided_slice %0 {offsets = [0, 4], sizes = [32, 4], strides = [1, 1]} : vector<32x8xf32> to vector<32x4xf32>
    %c0_3 = arith.constant 0 : index
    %c0_4 = arith.constant 0 : index
    %6 = vector.load %arg3[%c0_3, %c0_4] : memref<32x16xf32, #tpu.memory_space<vmem>>, vector<32x16xf32>
    %7 = tpu.concatenate %4, %6 in 1 : vector<32x4xf32>, vector<32x16xf32> -> vector<32x20xf32>
    %8 = arith.truncf %7 : vector<32x20xf32> to vector<32x20xbf16>
    %c0_5 = arith.constant 0 : index
    %c0_6 = arith.constant 0 : index
    %9 = vector.load %arg4[%c0_5, %c0_6] : memref<20x288xbf16, #tpu.memory_space<vmem>>, vector<20x288xbf16>
    %cst = arith.constant dense<0.000000e+00> : vector<32x288xf32>
    %10 = tpu.matmul %8, %9, %cst {dimension_numbers = #tpu.dot_dimension_numbers<[1], [0], [0], [1], [0, 0, 1, 1], [], []>} : vector<32x20xbf16>, vector<20x288xbf16>, vector<32x288xf32> -> vector<32x288xf32>
    %c0_7 = arith.constant 0 : index
    %c0_8 = arith.constant 0 : index
    %11 = vector.load %arg5[%c0_7, %c0_8] : memref<1x288xf32, #tpu.memory_space<vmem>>, vector<1x288xf32>
    %12 = vector.broadcast %11 : vector<1x288xf32> to vector<32x288xf32>
    %13 = arith.addf %10, %12 : vector<32x288xf32>
    %14 = vector.extract_strided_slice %13 {offsets = [0, 0], sizes = [32, 256], strides = [1, 1]} : vector<32x288xf32> to vector<32x256xf32>
    %15 = vector.extract_strided_slice %13 {offsets = [0, 256], sizes = [32, 32], strides = [1, 1]} : vector<32x288xf32> to vector<32x32xf32>
    %16 = arith.mulf %15, %3 : vector<32x32xf32>
    %cst_9 = arith.constant 0.000000e+00 : f32
    %17 = vector.broadcast %cst_9 : f32 to vector<2x32x32xf32>
    %c0_10 = arith.constant 0 : index
    %c0_11 = arith.constant 0 : index
    %c0_12 = arith.constant 0 : index
    %18 = vector.load %arg16[%c0_10, %c0_11, %c0_12] : memref<2x32x32xf32, #tpu.memory_space<vmem>>, vector<2x32x32xf32>
    tpu.vector_store %arg16[%c0_10, %c0_11, %c0_12], %17 {strides = array<i32>} : memref<2x32x32xf32, #tpu.memory_space<vmem>>, vector<2x32x32xf32>,
    %cst_13 = arith.constant 0.000000e+00 : f32
    %19 = vector.broadcast %cst_13 : f32 to vector<32x32xf32>
    %20 = vector.shape_cast %16 : vector<32x32xf32> to vector<2x16x32xf32>
    %c0_14 = arith.constant 0 : index
    %c8 = arith.constant 8 : index
    %c0_15 = arith.constant 0 : index
    %21 = vector.load %arg16[%c0_14, %c8, %c0_15] : memref<2x32x32xf32, #tpu.memory_space<vmem>>, vector<2x16x32xf32>
    tpu.vector_store %arg16[%c0_14, %c8, %c0_15], %20 {strides = array<i32>} : memref<2x32x32xf32, #tpu.memory_space<vmem>>, vector<2x16x32xf32>,
    %c0_16 = arith.constant 0 : index
    %c7 = arith.constant 7 : index
    %c0_17 = arith.constant 0 : index
    %22 = vector.load %arg16[%c0_16, %c7, %c0_17] : memref<2x32x32xf32, #tpu.memory_space<vmem>>, vector<2x16x32xf32>
    %23 = vector.shape_cast %22 : vector<2x16x32xf32> to vector<32x32xf32>
    %c0_18 = arith.constant 0 : index
    %c9 = arith.constant 9 : index
    %c0_19 = arith.constant 0 : index
    %24 = vector.load %arg16[%c0_18, %c9, %c0_19] : memref<2x32x32xf32, #tpu.memory_space<vmem>>, vector<2x16x32xf32>
    %25 = vector.shape_cast %24 : vector<2x16x32xf32> to vector<32x32xf32>
    %26 = tpu.concatenate %23, %16, %25 in 1 : vector<32x32xf32>, vector<32x32xf32>, vector<32x32xf32> -> vector<32x96xf32>
    %27 = arith.truncf %26 : vector<32x96xf32> to vector<32x96xbf16>
    %c0_20 = arith.constant 0 : index
    %c0_21 = arith.constant 0 : index
    %c0_22 = arith.constant 0 : index
    %28 = vector.load %arg6[%c0_20, %c0_21, %c0_22] : memref<4x96x64xbf16, #tpu.memory_space<vmem>>, vector<1x96x64xbf16>
    %29 = vector.shape_cast %28 : vector<1x96x64xbf16> to vector<96x64xbf16>
    %cst_23 = arith.constant dense<0.000000e+00> : vector<32x64xf32>
    %30 = tpu.matmul %27, %29, %cst_23 {dimension_numbers = #tpu.dot_dimension_numbers<[1], [0], [0], [1], [0, 0, 1, 1], [], []>} : vector<32x96xbf16>, vector<96x64xbf16>, vector<32x64xf32> -> vector<32x64xf32>
    %c0_24 = arith.constant 0 : index
    %c0_25 = arith.constant 0 : index
    %c0_26 = arith.constant 0 : index
    %31 = vector.load %arg7[%c0_24, %c0_25, %c0_26] : memref<4x1x64xf32, #tpu.memory_space<vmem>>, vector<1x1x64xf32>
    %32 = vector.shape_cast %31 : vector<1x1x64xf32> to vector<1x64xf32>
    %33 = vector.broadcast %32 : vector<1x64xf32> to vector<32x64xf32>
    %34 = arith.addf %30, %33 : vector<32x64xf32>
    %35 = vector.extract_strided_slice %14 {offsets = [0, 0], sizes = [32, 64], strides = [1, 1]} : vector<32x256xf32> to vector<32x64xf32>
    %36 = arith.addf %34, %35 : vector<32x64xf32>
    %37 = vector.extract_strided_slice %36 {offsets = [0, 0], sizes = [32, 32], strides = [1, 1]} : vector<32x64xf32> to vector<32x32xf32>
    %38 = math.tanh %37 : vector<32x32xf32>
    %39 = vector.extract_strided_slice %36 {offsets = [0, 32], sizes = [32, 32], strides = [1, 1]} : vector<32x64xf32> to vector<32x32xf32>
    %40 = arith.negf %39 : vector<32x32xf32>
    %41 = math.exp %40 : vector<32x32xf32>
    %cst_27 = arith.constant 1.000000e+00 : f32
    %42 = vector.broadcast %cst_27 : f32 to vector<32x32xf32>
    %43 = arith.addf %42, %41 : vector<32x32xf32>
    %44 = arith.divf %42, %43 : vector<32x32xf32>
    %45 = arith.mulf %38, %44 : vector<32x32xf32>
    %46 = arith.truncf %45 : vector<32x32xf32> to vector<32x32xbf16>
    %c0_28 = arith.constant 0 : index
    %c0_29 = arith.constant 0 : index
    %c0_30 = arith.constant 0 : index
    %47 = vector.load %arg8[%c0_28, %c0_29, %c0_30] : memref<3x32x64xbf16, #tpu.memory_space<vmem>>, vector<1x32x64xbf16>
    %48 = vector.shape_cast %47 : vector<1x32x64xbf16> to vector<32x64xbf16>
    %cst_31 = arith.constant dense<0.000000e+00> : vector<32x64xf32>
    %49 = tpu.matmul %46, %48, %cst_31 {dimension_numbers = #tpu.dot_dimension_numbers<[1], [0], [0], [1], [0, 0, 1, 1], [], []>} : vector<32x32xbf16>, vector<32x64xbf16>, vector<32x64xf32> -> vector<32x64xf32>
    %c0_32 = arith.constant 0 : index
    %c0_33 = arith.constant 0 : index
    %c0_34 = arith.constant 0 : index
    %50 = vector.load %arg9[%c0_32, %c0_33, %c0_34] : memref<3x1x64xf32, #tpu.memory_space<vmem>>, vector<1x1x64xf32>
    %51 = vector.shape_cast %50 : vector<1x1x64xf32> to vector<1x64xf32>
    %52 = vector.broadcast %51 : vector<1x64xf32> to vector<32x64xf32>
    %53 = arith.addf %49, %52 : vector<32x64xf32>
    %54 = vector.extract_strided_slice %53 {offsets = [0, 0], sizes = [32, 32], strides = [1, 1]} : vector<32x64xf32> to vector<32x32xf32>
    %55 = arith.addf %16, %54 : vector<32x32xf32>
    %56 = arith.mulf %55, %3 : vector<32x32xf32>
    %57 = vector.extract_strided_slice %53 {offsets = [0, 32], sizes = [32, 32], strides = [1, 1]} : vector<32x64xf32> to vector<32x32xf32>
    %58 = arith.addf %19, %57 : vector<32x32xf32>
    %59 = vector.shape_cast %56 : vector<32x32xf32> to vector<2x16x32xf32>
    %c0_35 = arith.constant 0 : index
    %c8_36 = arith.constant 8 : index
    %c0_37 = arith.constant 0 : index
    %60 = vector.load %arg16[%c0_35, %c8_36, %c0_37] : memref<2x32x32xf32, #tpu.memory_space<vmem>>, vector<2x16x32xf32>
    tpu.vector_store %arg16[%c0_35, %c8_36, %c0_37], %59 {strides = array<i32>} : memref<2x32x32xf32, #tpu.memory_space<vmem>>, vector<2x16x32xf32>,
    %c0_38 = arith.constant 0 : index
    %c6 = arith.constant 6 : index
    %c0_39 = arith.constant 0 : index
    %61 = vector.load %arg16[%c0_38, %c6, %c0_39] : memref<2x32x32xf32, #tpu.memory_space<vmem>>, vector<2x16x32xf32>
    %62 = vector.shape_cast %61 : vector<2x16x32xf32> to vector<32x32xf32>
    %c0_40 = arith.constant 0 : index
    %c10 = arith.constant 10 : index
    %c0_41 = arith.constant 0 : index
    %63 = vector.load %arg16[%c0_40, %c10, %c0_41] : memref<2x32x32xf32, #tpu.memory_space<vmem>>, vector<2x16x32xf32>
    %64 = vector.shape_cast %63 : vector<2x16x32xf32> to vector<32x32xf32>
    %65 = tpu.concatenate %62, %56, %64 in 1 : vector<32x32xf32>, vector<32x32xf32>, vector<32x32xf32> -> vector<32x96xf32>
    %66 = arith.truncf %65 : vector<32x96xf32> to vector<32x96xbf16>
    %c1 = arith.constant 1 : index
    %c0_42 = arith.constant 0 : index
    %c0_43 = arith.constant 0 : index
    %67 = vector.load %arg6[%c1, %c0_42, %c0_43] : memref<4x96x64xbf16, #tpu.memory_space<vmem>>, vector<1x96x64xbf16>
    %68 = vector.shape_cast %67 : vector<1x96x64xbf16> to vector<96x64xbf16>
    %cst_44 = arith.constant dense<0.000000e+00> : vector<32x64xf32>
    %69 = tpu.matmul %66, %68, %cst_44 {dimension_numbers = #tpu.dot_dimension_numbers<[1], [0], [0], [1], [0, 0, 1, 1], [], []>} : vector<32x96xbf16>, vector<96x64xbf16>, vector<32x64xf32> -> vector<32x64xf32>
    %c1_45 = arith.constant 1 : index
    %c0_46 = arith.constant 0 : index
    %c0_47 = arith.constant 0 : index
    %70 = vector.load %arg7[%c1_45, %c0_46, %c0_47] : memref<4x1x64xf32, #tpu.memory_space<vmem>>, vector<1x1x64xf32>
    %71 = vector.shape_cast %70 : vector<1x1x64xf32> to vector<1x64xf32>
    %72 = vector.broadcast %71 : vector<1x64xf32> to vector<32x64xf32>
    %73 = arith.addf %69, %72 : vector<32x64xf32>
    %74 = vector.extract_strided_slice %14 {offsets = [0, 64], sizes = [32, 64], strides = [1, 1]} : vector<32x256xf32> to vector<32x64xf32>
    %75 = arith.addf %73, %74 : vector<32x64xf32>
    %76 = vector.extract_strided_slice %75 {offsets = [0, 0], sizes = [32, 32], strides = [1, 1]} : vector<32x64xf32> to vector<32x32xf32>
    %77 = math.tanh %76 : vector<32x32xf32>
    %78 = vector.extract_strided_slice %75 {offsets = [0, 32], sizes = [32, 32], strides = [1, 1]} : vector<32x64xf32> to vector<32x32xf32>
    %79 = arith.negf %78 : vector<32x32xf32>
    %80 = math.exp %79 : vector<32x32xf32>
    %cst_48 = arith.constant 1.000000e+00 : f32
    %81 = vector.broadcast %cst_48 : f32 to vector<32x32xf32>
    %82 = arith.addf %81, %80 : vector<32x32xf32>
    %83 = arith.divf %81, %82 : vector<32x32xf32>
    %84 = arith.mulf %77, %83 : vector<32x32xf32>
    %85 = arith.truncf %84 : vector<32x32xf32> to vector<32x32xbf16>
    %c1_49 = arith.constant 1 : index
    %c0_50 = arith.constant 0 : index
    %c0_51 = arith.constant 0 : index
    %86 = vector.load %arg8[%c1_49, %c0_50, %c0_51] : memref<3x32x64xbf16, #tpu.memory_space<vmem>>, vector<1x32x64xbf16>
    %87 = vector.shape_cast %86 : vector<1x32x64xbf16> to vector<32x64xbf16>
    %cst_52 = arith.constant dense<0.000000e+00> : vector<32x64xf32>
    %88 = tpu.matmul %85, %87, %cst_52 {dimension_numbers = #tpu.dot_dimension_numbers<[1], [0], [0], [1], [0, 0, 1, 1], [], []>} : vector<32x32xbf16>, vector<32x64xbf16>, vector<32x64xf32> -> vector<32x64xf32>
    %c1_53 = arith.constant 1 : index
    %c0_54 = arith.constant 0 : index
    %c0_55 = arith.constant 0 : index
    %89 = vector.load %arg9[%c1_53, %c0_54, %c0_55] : memref<3x1x64xf32, #tpu.memory_space<vmem>>, vector<1x1x64xf32>
    %90 = vector.shape_cast %89 : vector<1x1x64xf32> to vector<1x64xf32>
    %91 = vector.broadcast %90 : vector<1x64xf32> to vector<32x64xf32>
    %92 = arith.addf %88, %91 : vector<32x64xf32>
    %93 = vector.extract_strided_slice %92 {offsets = [0, 0], sizes = [32, 32], strides = [1, 1]} : vector<32x64xf32> to vector<32x32xf32>
    %94 = arith.addf %56, %93 : vector<32x32xf32>
    %95 = arith.mulf %94, %3 : vector<32x32xf32>
    %96 = vector.extract_strided_slice %92 {offsets = [0, 32], sizes = [32, 32], strides = [1, 1]} : vector<32x64xf32> to vector<32x32xf32>
    %97 = arith.addf %58, %96 : vector<32x32xf32>
    %98 = vector.shape_cast %95 : vector<32x32xf32> to vector<2x16x32xf32>
    %c0_56 = arith.constant 0 : index
    %c8_57 = arith.constant 8 : index
    %c0_58 = arith.constant 0 : index
    %99 = vector.load %arg16[%c0_56, %c8_57, %c0_58] : memref<2x32x32xf32, #tpu.memory_space<vmem>>, vector<2x16x32xf32>
    tpu.vector_store %arg16[%c0_56, %c8_57, %c0_58], %98 {strides = array<i32>} : memref<2x32x32xf32, #tpu.memory_space<vmem>>, vector<2x16x32xf32>,
    %c0_59 = arith.constant 0 : index
    %c4 = arith.constant 4 : index
    %c0_60 = arith.constant 0 : index
    %100 = vector.load %arg16[%c0_59, %c4, %c0_60] : memref<2x32x32xf32, #tpu.memory_space<vmem>>, vector<2x16x32xf32>
    %101 = vector.shape_cast %100 : vector<2x16x32xf32> to vector<32x32xf32>
    %c0_61 = arith.constant 0 : index
    %c12 = arith.constant 12 : index
    %c0_62 = arith.constant 0 : index
    %102 = vector.load %arg16[%c0_61, %c12, %c0_62] : memref<2x32x32xf32, #tpu.memory_space<vmem>>, vector<2x16x32xf32>
    %103 = vector.shape_cast %102 : vector<2x16x32xf32> to vector<32x32xf32>
    %104 = tpu.concatenate %101, %95, %103 in 1 : vector<32x32xf32>, vector<32x32xf32>, vector<32x32xf32> -> vector<32x96xf32>
    %105 = arith.truncf %104 : vector<32x96xf32> to vector<32x96xbf16>
    %c2 = arith.constant 2 : index
    %c0_63 = arith.constant 0 : index
    %c0_64 = arith.constant 0 : index
    %106 = vector.load %arg6[%c2, %c0_63, %c0_64] : memref<4x96x64xbf16, #tpu.memory_space<vmem>>, vector<1x96x64xbf16>
    %107 = vector.shape_cast %106 : vector<1x96x64xbf16> to vector<96x64xbf16>
    %cst_65 = arith.constant dense<0.000000e+00> : vector<32x64xf32>
    %108 = tpu.matmul %105, %107, %cst_65 {dimension_numbers = #tpu.dot_dimension_numbers<[1], [0], [0], [1], [0, 0, 1, 1], [], []>} : vector<32x96xbf16>, vector<96x64xbf16>, vector<32x64xf32> -> vector<32x64xf32>
    %c2_66 = arith.constant 2 : index
    %c0_67 = arith.constant 0 : index
    %c0_68 = arith.constant 0 : index
    %109 = vector.load %arg7[%c2_66, %c0_67, %c0_68] : memref<4x1x64xf32, #tpu.memory_space<vmem>>, vector<1x1x64xf32>
    %110 = vector.shape_cast %109 : vector<1x1x64xf32> to vector<1x64xf32>
    %111 = vector.broadcast %110 : vector<1x64xf32> to vector<32x64xf32>
    %112 = arith.addf %108, %111 : vector<32x64xf32>
    %113 = vector.extract_strided_slice %14 {offsets = [0, 128], sizes = [32, 64], strides = [1, 1]} : vector<32x256xf32> to vector<32x64xf32>
    %114 = arith.addf %112, %113 : vector<32x64xf32>
    %115 = vector.extract_strided_slice %114 {offsets = [0, 0], sizes = [32, 32], strides = [1, 1]} : vector<32x64xf32> to vector<32x32xf32>
    %116 = math.tanh %115 : vector<32x32xf32>
    %117 = vector.extract_strided_slice %114 {offsets = [0, 32], sizes = [32, 32], strides = [1, 1]} : vector<32x64xf32> to vector<32x32xf32>
    %118 = arith.negf %117 : vector<32x32xf32>
    %119 = math.exp %118 : vector<32x32xf32>
    %cst_69 = arith.constant 1.000000e+00 : f32
    %120 = vector.broadcast %cst_69 : f32 to vector<32x32xf32>
    %121 = arith.addf %120, %119 : vector<32x32xf32>
    %122 = arith.divf %120, %121 : vector<32x32xf32>
    %123 = arith.mulf %116, %122 : vector<32x32xf32>
    %124 = arith.truncf %123 : vector<32x32xf32> to vector<32x32xbf16>
    %c2_70 = arith.constant 2 : index
    %c0_71 = arith.constant 0 : index
    %c0_72 = arith.constant 0 : index
    %125 = vector.load %arg8[%c2_70, %c0_71, %c0_72] : memref<3x32x64xbf16, #tpu.memory_space<vmem>>, vector<1x32x64xbf16>
    %126 = vector.shape_cast %125 : vector<1x32x64xbf16> to vector<32x64xbf16>
    %cst_73 = arith.constant dense<0.000000e+00> : vector<32x64xf32>
    %127 = tpu.matmul %124, %126, %cst_73 {dimension_numbers = #tpu.dot_dimension_numbers<[1], [0], [0], [1], [0, 0, 1, 1], [], []>} : vector<32x32xbf16>, vector<32x64xbf16>, vector<32x64xf32> -> vector<32x64xf32>
    %c2_74 = arith.constant 2 : index
    %c0_75 = arith.constant 0 : index
    %c0_76 = arith.constant 0 : index
    %128 = vector.load %arg9[%c2_74, %c0_75, %c0_76] : memref<3x1x64xf32, #tpu.memory_space<vmem>>, vector<1x1x64xf32>
    %129 = vector.shape_cast %128 : vector<1x1x64xf32> to vector<1x64xf32>
    %130 = vector.broadcast %129 : vector<1x64xf32> to vector<32x64xf32>
    %131 = arith.addf %127, %130 : vector<32x64xf32>
    %132 = vector.extract_strided_slice %131 {offsets = [0, 0], sizes = [32, 32], strides = [1, 1]} : vector<32x64xf32> to vector<32x32xf32>
    %133 = arith.addf %95, %132 : vector<32x32xf32>
    %134 = arith.mulf %133, %3 : vector<32x32xf32>
    %135 = vector.extract_strided_slice %131 {offsets = [0, 32], sizes = [32, 32], strides = [1, 1]} : vector<32x64xf32> to vector<32x32xf32>
    %136 = arith.addf %97, %135 : vector<32x32xf32>
    %137 = vector.shape_cast %134 : vector<32x32xf32> to vector<2x16x32xf32>
    %c0_77 = arith.constant 0 : index
    %c8_78 = arith.constant 8 : index
    %c0_79 = arith.constant 0 : index
    %138 = vector.load %arg16[%c0_77, %c8_78, %c0_79] : memref<2x32x32xf32, #tpu.memory_space<vmem>>, vector<2x16x32xf32>
    tpu.vector_store %arg16[%c0_77, %c8_78, %c0_79], %137 {strides = array<i32>} : memref<2x32x32xf32, #tpu.memory_space<vmem>>, vector<2x16x32xf32>,
    %c0_80 = arith.constant 0 : index
    %c0_81 = arith.constant 0 : index
    %c0_82 = arith.constant 0 : index
    %139 = vector.load %arg16[%c0_80, %c0_81, %c0_82] : memref<2x32x32xf32, #tpu.memory_space<vmem>>, vector<2x16x32xf32>
    %140 = vector.shape_cast %139 : vector<2x16x32xf32> to vector<32x32xf32>
    %c0_83 = arith.constant 0 : index
    %c16 = arith.constant 16 : index
    %c0_84 = arith.constant 0 : index
    %141 = vector.load %arg16[%c0_83, %c16, %c0_84] : memref<2x32x32xf32, #tpu.memory_space<vmem>>, vector<2x16x32xf32>
    %142 = vector.shape_cast %141 : vector<2x16x32xf32> to vector<32x32xf32>
    %143 = tpu.concatenate %140, %134, %142 in 1 : vector<32x32xf32>, vector<32x32xf32>, vector<32x32xf32> -> vector<32x96xf32>
    %144 = arith.truncf %143 : vector<32x96xf32> to vector<32x96xbf16>
    %c3 = arith.constant 3 : index
    %c0_85 = arith.constant 0 : index
    %c0_86 = arith.constant 0 : index
    %145 = vector.load %arg6[%c3, %c0_85, %c0_86] : memref<4x96x64xbf16, #tpu.memory_space<vmem>>, vector<1x96x64xbf16>
    %146 = vector.shape_cast %145 : vector<1x96x64xbf16> to vector<96x64xbf16>
    %cst_87 = arith.constant dense<0.000000e+00> : vector<32x64xf32>
    %147 = tpu.matmul %144, %146, %cst_87 {dimension_numbers = #tpu.dot_dimension_numbers<[1], [0], [0], [1], [0, 0, 1, 1], [], []>} : vector<32x96xbf16>, vector<96x64xbf16>, vector<32x64xf32> -> vector<32x64xf32>
    %c3_88 = arith.constant 3 : index
    %c0_89 = arith.constant 0 : index
    %c0_90 = arith.constant 0 : index
    %148 = vector.load %arg7[%c3_88, %c0_89, %c0_90] : memref<4x1x64xf32, #tpu.memory_space<vmem>>, vector<1x1x64xf32>
    %149 = vector.shape_cast %148 : vector<1x1x64xf32> to vector<1x64xf32>
    %150 = vector.broadcast %149 : vector<1x64xf32> to vector<32x64xf32>
    %151 = arith.addf %147, %150 : vector<32x64xf32>
    %152 = vector.extract_strided_slice %14 {offsets = [0, 192], sizes = [32, 64], strides = [1, 1]} : vector<32x256xf32> to vector<32x64xf32>
    %153 = arith.addf %151, %152 : vector<32x64xf32>
    %154 = vector.extract_strided_slice %153 {offsets = [0, 0], sizes = [32, 32], strides = [1, 1]} : vector<32x64xf32> to vector<32x32xf32>
    %155 = math.tanh %154 : vector<32x32xf32>
    %156 = vector.extract_strided_slice %153 {offsets = [0, 32], sizes = [32, 32], strides = [1, 1]} : vector<32x64xf32> to vector<32x32xf32>
    %157 = arith.negf %156 : vector<32x32xf32>
    %158 = math.exp %157 : vector<32x32xf32>
    %cst_91 = arith.constant 1.000000e+00 : f32
    %159 = vector.broadcast %cst_91 : f32 to vector<32x32xf32>
    %160 = arith.addf %159, %158 : vector<32x32xf32>
    %161 = arith.divf %159, %160 : vector<32x32xf32>
    %162 = arith.mulf %155, %161 : vector<32x32xf32>
    %163 = arith.truncf %162 : vector<32x32xf32> to vector<32x32xbf16>
    %c0_92 = arith.constant 0 : index
    %c0_93 = arith.constant 0 : index
    %164 = vector.load %arg10[%c0_92, %c0_93] : memref<32x32xbf16, #tpu.memory_space<vmem>>, vector<32x32xbf16>
    %cst_94 = arith.constant dense<0.000000e+00> : vector<32x32xf32>
    %165 = tpu.matmul %163, %164, %cst_94 {dimension_numbers = #tpu.dot_dimension_numbers<[1], [0], [0], [1], [0, 0, 1, 1], [], []>} : vector<32x32xbf16>, vector<32x32xbf16>, vector<32x32xf32> -> vector<32x32xf32>
    %c0_95 = arith.constant 0 : index
    %c0_96 = arith.constant 0 : index
    %166 = vector.load %arg11[%c0_95, %c0_96] : memref<1x32xf32, #tpu.memory_space<vmem>>, vector<1x32xf32>
    %167 = vector.broadcast %166 : vector<1x32xf32> to vector<32x32xf32>
    %168 = arith.addf %165, %167 : vector<32x32xf32>
    %169 = arith.addf %136, %168 : vector<32x32xf32>
    %170 = arith.mulf %169, %3 : vector<32x32xf32>
    %c0_97 = arith.constant 0 : index
    %c0_98 = arith.constant 0 : index
    %171 = vector.load %arg12[%c0_97, %c0_98] : memref<32x8xf32, #tpu.memory_space<vmem>>, vector<32x8xf32>
    %cst_99 = arith.constant dense<0.000000e+00> : vector<32x8xf32>
    %172 = tpu.matmul %170, %171, %cst_99 {dimension_numbers = #tpu.dot_dimension_numbers<[1], [0], [0], [1], [0, 0, 1, 1], [], []>} : vector<32x32xf32>, vector<32x8xf32>, vector<32x8xf32> -> vector<32x8xf32>
    %c0_100 = arith.constant 0 : index
    %c0_101 = arith.constant 0 : index
    %173 = vector.load %arg13[%c0_100, %c0_101] : memref<1x8xf32, #tpu.memory_space<vmem>>, vector<1x8xf32>
    %174 = vector.broadcast %173 : vector<1x8xf32> to vector<32x8xf32>
    %175 = arith.addf %172, %174 : vector<32x8xf32>
    %176 = vector.broadcast %1 : vector<32x1xf32> to vector<32x8xf32>
    %177 = arith.mulf %175, %176 : vector<32x8xf32>
    %178 = vector.extract_strided_slice %177 {offsets = [0, 0], sizes = [32, 4], strides = [1, 1]} : vector<32x8xf32> to vector<32x4xf32>
    %179 = vector.extract_strided_slice %177 {offsets = [0, 4], sizes = [32, 4], strides = [1, 1]} : vector<32x8xf32> to vector<32x4xf32>
    %180 = math.exp %179 : vector<32x4xf32>
    %181 = arith.mulf %5, %180 : vector<32x4xf32>
    %182 = vector.broadcast %1 : vector<32x1xf32> to vector<32x4xf32>
    %183 = arith.mulf %181, %182 : vector<32x4xf32>
    %184 = arith.addf %178, %183 : vector<32x4xf32>
    %c0_102 = arith.constant 0 : index
    %c0_103 = arith.constant 0 : index
    %185 = vector.load %arg14[%c0_102, %c0_103] : memref<32x8xf32, #tpu.memory_space<vmem>>, vector<32x4xf32>
    tpu.vector_store %arg14[%c0_102, %c0_103], %4 {strides = array<i32>} : memref<32x8xf32, #tpu.memory_space<vmem>>, vector<32x4xf32>,
    %c0_104 = arith.constant 0 : index
    %c4_105 = arith.constant 4 : index
    %186 = vector.load %arg14[%c0_104, %c4_105] : memref<32x8xf32, #tpu.memory_space<vmem>>, vector<32x4xf32>
    tpu.vector_store %arg14[%c0_104, %c4_105], %184 {strides = array<i32>} : memref<32x8xf32, #tpu.memory_space<vmem>>, vector<32x4xf32>,
    %cst_106 = arith.constant dense<0.000000e+00> : vector<32xf32>
    %187 = vector.multi_reduction <add>, %179, %cst_106 [1] : vector<32x4xf32> to vector<32xf32>
    %188 = vector.shape_cast %187 : vector<32xf32> to vector<32x1xf32>
    %189 = vector.extract_strided_slice %188 {offsets = [0, 0], sizes = [16, 1], strides = [1, 1]} : vector<32x1xf32> to vector<16x1xf32>
    %cst_107 = arith.constant dense<0.000000e+00> : vector<1xf32>
    %190 = vector.multi_reduction <add>, %189, %cst_107 [0] : vector<16x1xf32> to vector<1xf32>
    %191 = vector.shape_cast %190 : vector<1xf32> to vector<1x1xf32>
    %192 = vector.extract_strided_slice %188 {offsets = [16, 0], sizes = [16, 1], strides = [1, 1]} : vector<32x1xf32> to vector<16x1xf32>
    %cst_108 = arith.constant dense<0.000000e+00> : vector<1xf32>
    %193 = vector.multi_reduction <add>, %192, %cst_108 [0] : vector<16x1xf32> to vector<1xf32>
    %194 = vector.shape_cast %193 : vector<1xf32> to vector<1x1xf32>
    %195 = tpu.concatenate %191, %194 in 0 : vector<1x1xf32>, vector<1x1xf32> -> vector<2x1xf32>
    %c0_109 = arith.constant 0 : index
    %c0_110 = arith.constant 0 : index
    %196 = vector.load %arg15[%c0_109, %c0_110] : memref<2x1xf32, #tpu.memory_space<vmem>>, vector<2x1xf32>
    tpu.vector_store %arg15[%c0_109, %c0_110], %195 {strides = array<i32>} : memref<2x1xf32, #tpu.memory_space<vmem>>, vector<2x1xf32>,
    return
  }
  func.func @transform_0(%arg0: i32) -> (i32, i32) {
    %c0_i32 = arith.constant 0 : i32
    %c0_i32_0 = arith.constant 0 : i32
    %c0_i32_1 = arith.constant 0 : i32
    return %c0_i32, %c0_i32_0 : i32, i32
  }
  func.func @transform_1(%arg0: i32) -> (i32, i32) {
    %c0_i32 = arith.constant 0 : i32
    %c0_i32_0 = arith.constant 0 : i32
    %c0_i32_1 = arith.constant 0 : i32
    return %c0_i32, %c0_i32_0 : i32, i32
  }
  func.func @transform_2(%arg0: i32) -> (i32, i32) {
    %c0_i32 = arith.constant 0 : i32
    %c0_i32_0 = arith.constant 0 : i32
    %c0_i32_1 = arith.constant 0 : i32
    return %c0_i32, %c0_i32_0 : i32, i32
  }
  func.func @transform_3(%arg0: i32) -> (i32, i32) {
    %c0_i32 = arith.constant 0 : i32
    %c0_i32_0 = arith.constant 0 : i32
    %c0_i32_1 = arith.constant 0 : i32
    return %c0_i32, %c0_i32_0 : i32, i32
  }
  func.func @transform_4(%arg0: i32) -> (i32, i32) {
    %c0_i32 = arith.constant 0 : i32
    %c0_i32_0 = arith.constant 0 : i32
    %c0_i32_1 = arith.constant 0 : i32
    return %c0_i32, %c0_i32_0 : i32, i32
  }
  func.func @transform_5(%arg0: i32) -> (i32, i32, i32) {
    %c0_i32 = arith.constant 0 : i32
    %c0_i32_0 = arith.constant 0 : i32
    %c0_i32_1 = arith.constant 0 : i32
    %c0_i32_2 = arith.constant 0 : i32
    return %c0_i32, %c0_i32_0, %c0_i32_1 : i32, i32, i32
  }
  func.func @transform_6(%arg0: i32) -> (i32, i32, i32) {
    %c0_i32 = arith.constant 0 : i32
    %c0_i32_0 = arith.constant 0 : i32
    %c0_i32_1 = arith.constant 0 : i32
    %c0_i32_2 = arith.constant 0 : i32
    return %c0_i32, %c0_i32_0, %c0_i32_1 : i32, i32, i32
  }
  func.func @transform_7(%arg0: i32) -> (i32, i32, i32) {
    %c0_i32 = arith.constant 0 : i32
    %c0_i32_0 = arith.constant 0 : i32
    %c0_i32_1 = arith.constant 0 : i32
    %c0_i32_2 = arith.constant 0 : i32
    return %c0_i32, %c0_i32_0, %c0_i32_1 : i32, i32, i32
  }
  func.func @transform_8(%arg0: i32) -> (i32, i32, i32) {
    %c0_i32 = arith.constant 0 : i32
    %c0_i32_0 = arith.constant 0 : i32
    %c0_i32_1 = arith.constant 0 : i32
    %c0_i32_2 = arith.constant 0 : i32
    return %c0_i32, %c0_i32_0, %c0_i32_1 : i32, i32, i32
  }
  func.func @transform_9(%arg0: i32) -> (i32, i32) {
    %c0_i32 = arith.constant 0 : i32
    %c0_i32_0 = arith.constant 0 : i32
    %c0_i32_1 = arith.constant 0 : i32
    return %c0_i32, %c0_i32_0 : i32, i32
  }
  func.func @transform_10(%arg0: i32) -> (i32, i32) {
    %c0_i32 = arith.constant 0 : i32
    %c0_i32_0 = arith.constant 0 : i32
    %c0_i32_1 = arith.constant 0 : i32
    return %c0_i32, %c0_i32_0 : i32, i32
  }
  func.func @transform_11(%arg0: i32) -> (i32, i32) {
    %c0_i32 = arith.constant 0 : i32
    %c0_i32_0 = arith.constant 0 : i32
    %c0_i32_1 = arith.constant 0 : i32
    return %c0_i32, %c0_i32_0 : i32, i32
  }
  func.func @transform_12(%arg0: i32) -> (i32, i32) {
    %c0_i32 = arith.constant 0 : i32
    %c0_i32_0 = arith.constant 0 : i32
    %c0_i32_1 = arith.constant 0 : i32
    return %c0_i32, %c0_i32_0 : i32, i32
  }
  func.func @transform_13(%arg0: i32) -> (i32, i32) {
    %c0_i32 = arith.constant 0 : i32
    %c0_i32_0 = arith.constant 0 : i32
    %c0_i32_1 = arith.constant 0 : i32
    return %c0_i32, %c0_i32_0 : i32, i32
  }
  func.func @transform_14(%arg0: i32) -> (i32, i32) {
    %c0_i32 = arith.constant 0 : i32
    %c0_i32_0 = arith.constant 0 : i32
    %c0_i32_1 = arith.constant 0 : i32
    return %c0_i32, %c0_i32_0 : i32, i32
  }
}

</mosaic_0001>

<bundles_post_ra>
// kernel: tpu_custom_call.1
= control target key start
LH: loop header
LB: loop body
LE: loop exit
PB: predicated region body
PF: predicated region fallthrough
CT: control target
= control target key end

     0   :  { %s2120_s21 = smov 4   ;;  %vm147_vm0 = vcmask 1041408   ;;  %v2121_v26 = vmov 0   ;;  %vm95_vm1 = vcmask 31744   ;;  %vm140_vm2 = vcmask 162816   ;;  %s2123_s23 = smov 32   ;;  %s2844_s2 = inlined_call_operand.vmem [shape: f32[32,16], index: 2, kind: input, shape index: {}]   ;;  %s2845_s3 = inlined_call_operand.vmem [shape: bf16[20,288], index: 3, kind: input, shape index: {}]   ;;  %s2846_s1 = inlined_call_operand.vmem [shape: f32[32,1], index: 1, kind: input, shape index: {}]   ;;  %s2847_s0 = inlined_call_operand.vmem [shape: f32[32,8], index: 0, kind: input, shape index: {}]   ;;  %s2848_s4 = inlined_call_operand.vmem [shape: f32[1,288], index: 4, kind: input, shape index: {}]   ;;  %s2849_s5 = inlined_call_operand.vmem [shape: bf16[4,96,64], index: 5, kind: input, shape index: {}]   ;;  %s2850_s6 = inlined_call_operand.vmem [shape: f32[4,1,64], index: 6, kind: input, shape index: {}]   ;;  %s2851_s7 = inlined_call_operand.vmem [shape: bf16[3,32,64], index: 7, kind: input, shape index: {}]   ;;  %s2852_s8 = inlined_call_operand.vmem [shape: f32[3,1,64], index: 8, kind: input, shape index: {}]   ;;  %s2853_s9 = inlined_call_operand.vmem [shape: bf16[32,32], index: 9, kind: input, shape index: {}]   ;;  %s2854_s10 = inlined_call_operand.vmem [shape: f32[1,32], index: 10, kind: input, shape index: {}]   ;;  %s2855_s11 = inlined_call_operand.vmem [shape: f32[32,8], index: 11, kind: input, shape index: {}]   ;;  %s2856_s12 = inlined_call_operand.vmem [shape: f32[1,8], index: 12, kind: input, shape index: {}]   ;;  %s2857_s13 = inlined_call_operand.vmem [shape: f32[32,8], index: 13, kind: output, shape index: {0}]   ;;  %s2858_s14 = inlined_call_operand.vmem [shape: f32[2,1], index: 14, kind: output, shape index: {1}]  }
   0x1   :  { %v75_v0 = vld [vmem:[%s2844_s2] sm:$0xff]  ;;  %v76_v1 = vld [vmem:[%s2844_s2 + $0x8] sm:$0xff]  ;;  %v106_v3 = vld [vmem:[%s2845_s3 + $0x18] sm:$0x33]  ;;  %1920 = vset.pattern.permute.xlu1 %v2121_v26  ;;  %1921 = vset.pattern.permute.xlu2 %v2121_v26  ;;  %vm218_vm3 = vcmask 261120   ;;  %v2122_v47 = vmov 0.0  }
   0x2   :  { %v1910_v2 = vpack.i.bf16 %v76_v1, %v75_v0  ;;  %v107_v4 = vld [vmem:[%s2845_s3 + $0x20] sm:$0x3]  ;;  %v128_v5 = vunpack.c.l.b16 %v106_v3  ;;  %v129_v6 = vunpack.c.h.b16 %v106_v3  ;;  %v77_v8 = vld [vmem:[%s2844_s2 + $0x10] sm:$0xff]  ;;  %v78_v9 = vld [vmem:[%s2844_s2 + $0x18] sm:$0xff]  ;;  %2002 = vset.pattern.permute.xlu0 %v2121_v26  ;;  %219 = vst.msk [vmem:[#allocation2] sm:$0xff] %vm218_vm3, %v2122_v47  ;;  %s2124_s24 = smov 64  }
   0x3   :  { %v130_v7 = vunpack.c.l.b16 %v107_v4  ;;  %v1915_v16 = vpack.i.bf16 %v78_v9, %v77_v8  ;;  %v1635_v17 = vld [vmem:[%s2845_s3] sm:$0xf]  ;;  %v1865_v18 = vld [vmem:[%s2845_s3 + $0x8] sm:$0xf0]  ;;  %v1864_v19 = vld [vmem:[%s2845_s3 + $0x4] sm:$0xf] }
   0x4   :  { %1911 = vrot.lane.b32.xlu0 %v1910_v2, %s2120_s21  ;;  %v134_v10 = vpack.c.b16 %v128_v5, %v128_v5  ;;  %v135_v11 = vpack.c.b16 %v129_v6, %v129_v6  ;;  %v1636_v20 = vor.u32 %v1865_v18, %v1635_v17  ;;  %v1637_v21 = vld [vmem:[%s2845_s3 + $0xc] sm:$0xf0]  ;;  %v1643_v22 = vld [vmem:[%s2845_s3 + $0x8] sm:$0xf]  ;;  %v1866_v23 = vld [vmem:[%s2845_s3 + $0x10] sm:$0xf0] }
   0x5   :  { %v136_v12 = vpack.c.b16 %v130_v7, %v130_v7  ;;  %v1640_v24 = vor.u32 %v1864_v19, %v1637_v21  ;;  %v1644_v25 = vor.u32 %v1866_v23, %v1643_v22  ;;  %v51_v27 = vld [vmem:[%s2846_s1] sm:$0xff]  ;;  %v52_v28 = vld [vmem:[%s2846_s1 + $0x8] sm:$0xff]  ;;  %v53_v29 = vld [vmem:[%s2846_s1 + $0x10] sm:$0xff]  ;;  %220 = vst.msk [vmem:[#allocation2 + $0x8] sm:$0xff] %vm218_vm3, %v2122_v47  ;;  %vm275_vm4 = vcmask 523264   ;;  %s2125_s20 = smov 96  }
   0x6   :  { %v149_v13 = vsel %vm147_vm0, %v134_v10, 0  ;;  %v152_v14 = vsel %vm147_vm0, %v135_v11, 0  ;;  %57 = vperm.xlu1 %1920, %v51_v27   ;;  %67 = vperm.xlu2 %1921, %v53_v29   ;;  %v54_v30 = vld [vmem:[%s2846_s1 + $0x18] sm:$0xff]  ;;  %v47_v32 = vld [vmem:[%s2847_s0] sm:$0xff]  ;;  %v48_v33 = vld [vmem:[%s2847_s0 + $0x8] sm:$0xff]  ;;  %223 = vst.msk [vmem:[#allocation2 + $0x20] sm:$0xff] %vm218_vm3, %v2122_v47 }
   0x7   :  { %v155_v15 = vsel %vm147_vm0, %v136_v12, 0  ;;  %163 = vmatpush.bf16.msra.mxu0 %v149_v13  ;;  %182 = vmatpush.bf16.msra.mxu1 %v152_v14  ;;  %v49_v42 = vld [vmem:[%s2847_s0 + $0x10] sm:$0xff]  ;;  %v50_v43 = vld [vmem:[%s2847_s0 + $0x18] sm:$0xff]  ;;  %221 = vst.msk [vmem:[#allocation2 + $0x10] sm:$0xff] %vm218_vm3, %v2122_v47  ;;  %v2279_v48 = vld [vmem:[%s2848_s4] sm:$0x7] }
   0x8   :  { %201 = vmatpush.bf16.msra.mxu2 %v155_v15  ;;  %222 = vst.msk [vmem:[#allocation2 + $0x18] sm:$0xff] %vm218_vm3, %v2122_v47  ;;  %v2282_v49 = vperm.slane %v2279_v48, 1  ;;  %v112_v52 = vperm.slane %v2279_v48, 2  ;;  %v1872_v59 = vld [vmem:[%s2849_s5 + $0x28] sm:$0xff]  ;;  %v1871_v18 = vld [vmem:[%s2849_s5 + $0x20] sm:$0xff]  ;;  %v1870_v19 = vld [vmem:[%s2849_s5 + $0x18] sm:$0xff] }
   0x9   :  { %224 = vst.msk [vmem:[#allocation2 + $0x28] sm:$0xff] %vm218_vm3, %v2122_v47  ;;  %343 = vmatpush.bf16.msra.mxu3 %v1872_v59  ;;  %v1868_v21 = vld [vmem:[%s2849_s5 + $0x8] sm:$0xff]  ;;  %v1867_v22 = vld [vmem:[%s2849_s5] sm:$0xff]  ;;  %vm334_vm5 = vcmask 785408  }
   0xa   :  { %225 = vst.msk [vmem:[#allocation2 + $0x30] sm:$0xff] %vm218_vm3, %v2122_v47 }
   0xb   :  { %164 = vmatpush.bf16.msra.mxu0 %v1636_v20  ;;  %183 = vmatpush.bf16.msra.mxu1 %v1640_v24  ;;  %226 = vst.msk [vmem:[#allocation2 + $0x38] sm:$0xff] %vm218_vm3, %v2122_v47  ;;  %v1869_v20 = vld [vmem:[%s2849_s5 + $0x10] sm:$0xff] }
   0xc   :  { %1916 = vrot.lane.b32.xlu0 %v1915_v16, %s2120_s21  ;;  %202 = vmatpush.bf16.msra.mxu2 %v1644_v25 }
   0xd   :  { %344 = vmatpush.bf16.msra.mxu3 %v1871_v18 }
   0xe   :  { %62 = vperm.xlu1 %1920, %v52_v28   ;;  %72 = vperm.xlu2 %1921, %v54_v30  }
  0x11   :  { %345 = vmatpush.bf16.msra.mxu3 %v1870_v19 }
  0x15   :  { %346 = vmatpush.bf16.msra.mxu3 %v1869_v20 }
  0x19   :  { %347 = vmatpush.bf16.msra.mxu3 %v1868_v21 }
  0x1d   :  { %348 = vmatpush.bf16.msra.mxu3 %v1867_v22 }
  0x60   :  { %v2314_v3 = vpop.permute.xlu2 %67 }
  0x68   :  { %v2322_v12 = vpop.permute.xlu2 %72 }
  0x76   :  { %v1912_v31 = vpop.permute.xlu0 %1911 }
  0x77   :  { %v1914_v34 = vunpack.i.h.bf16 %v1912_v31  ;;  %v1913_v35 = vunpack.i.l.bf16 %v1912_v31 }
  0x78   :  { %v2288_v53 = vpop.permute.xlu1 %57 }
  0x79   :  { %v96_v36 = vsel %vm95_vm1, %v47_v32, %v1913_v35  ;;  %v97_v37 = vsel %vm95_vm1, %v48_v33, %v1914_v34 }
  0x7a   :  { %v100_v38 = vpack.c.bf16 %v97_v37, %v96_v36 }
  0x7c   :  { %1645 = vmatmul.msk.bf16.vlgmr.msra.gmra.mxu0 %vm140_vm2, %v100_v38  ;;  %1647 = vmatmul.msk.bf16.vlgmr.msra.gmra.mxu1 %vm140_vm2, %v100_v38 }
  0x7d   :  { %1649 = vmatmul.msk.bf16.vlgmr.msra.gmra.mxu2 %vm140_vm2, %v100_v38 }
  0x7e   :  { %v1917_v39 = vpop.permute.xlu0 %1916 }
  0x7f   :  { %v1919_v40 = vunpack.i.h.bf16 %v1917_v39  ;;  %v1918_v41 = vunpack.i.l.bf16 %v1917_v39 }
  0x80   :  { %v2301_v63 = vpop.permute.xlu1 %62 }
  0x81   :  { %v98_v44 = vsel %vm95_vm1, %v49_v42, %v1918_v41  ;;  %v99_v45 = vsel %vm95_vm1, %v50_v43, %v1919_v40 }
  0x82   :  { %v101_v46 = vpack.c.bf16 %v99_v45, %v98_v44 }
  0x8c   :  { %1646 = vmatmul.msk.bf16.gmra.mxu0 %vm140_vm2, %v101_v46  ;;  %1648 = vmatmul.msk.bf16.gmra.mxu1 %vm140_vm2, %v101_v46 }
  0x8d   :  { %1650 = vmatmul.msk.bf16.gmra.mxu2 %vm140_vm2, %v101_v46 }
  0xf9   :  { %v185_v50 = vpop.f32.mrf.mxu1 }
  0xfa   :  { %v2285_v51 = vadd.f32 %v185_v50, %v2282_v49 }
 0x100   :  { %v204_v54 = vpop.f32.mrf.mxu2 }
 0x101   :  { %v205_v55 = vadd.f32 %v204_v54, %v112_v52  ;;  %v187_v56 = vpop.f32.mrf.mxu1  ;;  %v110_v54 = vperm.slane %v2279_v48, 0 }
 0x102   :  { %v2291_v57 = vadd.f32 %v187_v56, %v2282_v49 }
 0x103   :  { %v2294_v58 = vmul.f32 %v205_v55, %v2288_v53  ;;  %v2003_v55 = vld [vmem:[%s2850_s6] ss:$0 sm:$0xff] }
 0x105   :  { %227 = vst.msk [vmem:[#allocation2 + $0x8] sm:$0xff] %vm218_vm3, %v2294_v58 }
 0x108   :  { %v206_v60 = vpop.f32.mrf.mxu2 }
 0x109   :  { %v207_v61 = vadd.f32 %v206_v60, %v112_v52  ;;  %v190_v62 = vpop.f32.mrf.mxu1 }
 0x10a   :  { %v2304_v0 = vadd.f32 %v190_v62, %v2282_v49 }
 0x10b   :  { %v2307_v1 = vmul.f32 %v207_v61, %v2301_v63 }
 0x10c   :  { %v231_v27 = vld [vmem:[#allocation2 + $0x7] sm:$0xff] }
 0x10d   :  { %228 = vst.msk [vmem:[#allocation2 + $0x10] sm:$0xff] %vm218_vm3, %v2307_v1  ;;  %v1922_v2 = vpack.i.bf16 %v2307_v1, %v2294_v58 }
 0x10f   :  { %1923 = vrot.lane.b32.xlu0 %v1922_v2, %s2123_s23 }
 0x110   :  { %v209_v4 = vpop.f32.mrf.mxu2 }
 0x111   :  { %v210_v5 = vadd.f32 %v209_v4, %v112_v52 }
 0x113   :  { %v2317_v6 = vmul.f32 %v210_v5, %v2314_v3 }
 0x114   :  { %v235_v7 = vld [vmem:[#allocation2 + $0x9] sm:$0xff]  ;;  %v236_v8 = vld [vmem:[#allocation2 + $0x11] sm:$0xff] }
 0x115   :  { %229 = vst.msk [vmem:[#allocation2 + $0x28] sm:$0xff] %vm218_vm3, %v2317_v6  ;;  %v1927_v9 = vpack.i.bf16 %v236_v8, %v235_v7  ;;  %v232_v28 = vld [vmem:[#allocation2 + $0xf] sm:$0xff] }
 0x117   :  { %1928 = vrot.lane.b32.xlu1 %v1927_v9, %s2124_s24 }
 0x118   :  { %v211_v10 = vpop.f32.mrf.mxu2 }
 0x119   :  { %v212_v11 = vadd.f32 %v211_v10, %v112_v52  ;;  %v166_v52 = vpop.f32.mrf.mxu0 }
 0x11a   :  { %v2362_v59 = vadd.f32 %v166_v52, %v110_v54 }
 0x11b   :  { %v2325_v13 = vmul.f32 %v212_v11, %v2322_v12 }
 0x11c   :  { %v233_v40 = vld [vmem:[#allocation2 + $0x27] sm:$0xff] }
 0x11d   :  { %230 = vst.msk [vmem:[#allocation2 + $0x30] sm:$0xff] %vm218_vm3, %v2325_v13  ;;  %v1932_v14 = vpack.i.bf16 %v2325_v13, %v2317_v6 }
 0x11f   :  { %1933 = vrot.lane.b32.xlu2 %v1932_v14, %s2123_s23 }
 0x121   :  { %v168_v61 = vpop.f32.mrf.mxu0 }
 0x122   :  { %v2368_v5 = vadd.f32 %v168_v61, %v110_v54 }
 0x124   :  { %v237_v15 = vld [vmem:[#allocation2 + $0x29] sm:$0xff]  ;;  %v238_v16 = vld [vmem:[#allocation2 + $0x31] sm:$0xff] }
 0x125   :  { %v1937_v17 = vpack.i.bf16 %v238_v16, %v237_v15  ;;  %v234_v41 = vld [vmem:[#allocation2 + $0x2f] sm:$0xff] }
 0x127   :  { %1938 = vrot.lane.b32.xlu0 %v1937_v17, %s2124_s24 }
 0x129   :  { %v171_v8 = vpop.f32.mrf.mxu0 }
 0x12a   :  { %v2374_v15 = vadd.f32 %v171_v8, %v110_v54 }
 0x131   :  { %v173_v21 = vpop.f32.mrf.mxu0 }
 0x179   :  { %v1934_v36 = vpop.permute.xlu2 %1933 }
 0x17a   :  { %v1936_v37 = vunpack.i.h.bf16 %v1934_v36  ;;  %v1935_v38 = vunpack.i.l.bf16 %v1934_v36 }
 0x17c   :  { %v273_v44 = vsel %vm218_vm3, %v233_v40, %v1935_v38  ;;  %v274_v45 = vsel %vm218_vm3, %v234_v41, %v1936_v37 }
 0x181   :  { %v1924_v23 = vpop.permute.xlu0 %1923 }
 0x182   :  { %v1926_v24 = vunpack.i.h.bf16 %v1924_v23  ;;  %v1925_v25 = vunpack.i.l.bf16 %v1924_v23 }
 0x184   :  { %v271_v31 = vsel %vm218_vm3, %v231_v27, %v1925_v25  ;;  %v272_v32 = vsel %vm218_vm3, %v232_v28, %v1926_v24  ;;  %v2380_v25 = vadd.f32 %v173_v21, %v110_v54  ;;  %v1874_v28 = vld [vmem:[%s2851_s7 + $0x8] sm:$0xff] }
 0x185   :  { %498 = vmatpush.bf16.msrb.mxu0 %v1874_v28 }
 0x189   :  { %v1929_v26 = vpop.permute.xlu1 %1928 }
 0x18a   :  { %v1931_v29 = vunpack.i.h.bf16 %v1929_v26  ;;  %v1930_v30 = vunpack.i.l.bf16 %v1929_v26 }
 0x18c   :  { %v276_v33 = vsel %vm275_vm4, %v271_v31, %v1930_v30  ;;  %v277_v34 = vsel %vm275_vm4, %v272_v32, %v1931_v29 }
 0x18d   :  { %v280_v35 = vpack.c.bf16 %v277_v34, %v276_v33 }
 0x18f   :  { %1675 = vmatmul.msk.bf16.vlgmr.msra.gmra.mxu3 %vm334_vm5, %v280_v35 }
 0x199   :  { %v1939_v39 = vpop.permute.xlu0 %1938 }
 0x19a   :  { %v1941_v42 = vunpack.i.h.bf16 %v1939_v39  ;;  %v1940_v43 = vunpack.i.l.bf16 %v1939_v39 }
 0x19c   :  { %v278_v46 = vsel %vm275_vm4, %v273_v44, %v1940_v43  ;;  %v279_v47 = vsel %vm275_vm4, %v274_v45, %v1941_v42 }
 0x19d   :  { %v281_v50 = vpack.c.bf16 %v279_v47, %v278_v46 }
 0x19f   :  { %1676 = vmatmul.msk.bf16.gmra.mxu3 %vm334_vm5, %v281_v50 }
 0x212   :  { %v350_v56 = vpop.f32.mrf.mxu3 }
 0x213   :  { %v351_v60 = vadd.f32 %v2003_v55, %v350_v56 }
 0x215   :  { %v2365_v62 = vadd.f32 %v351_v60, %v2362_v59 }
 0x217   :  { %v1677_v2 = vmul.f32 -1.442695, %v2365_v62 }
 0x219   :  { %2012 = vpow2.f32 %v1677_v2 }
 0x21a   :  { %v352_v4 = vpop.f32.mrf.mxu3 }
 0x21b   :  { %v353_v7 = vadd.f32 %v2003_v55, %v352_v4 }
 0x21d   :  { %v2371_v48 = vadd.f32 %v353_v7, %v2368_v5 }
 0x21f   :  { %v2013_v9 = vpop.eup %2012  ;;  %v1678_v10 = vmul.f32 -1.442695, %v2371_v48 }
 0x220   :  { %v380_v11 = vadd.f32 1.0, %v2013_v9 }
 0x221   :  { %2014 = vpow2.f32 %v1678_v10 }
 0x222   :  { %2016 = vrcp.f32 %v380_v11  ;;  %v355_v14 = vpop.f32.mrf.mxu3  ;;  %v395_v29 = vand.u32 2147483648, %v380_v11  ;;  %v393_v32 = vand.u32 2147483647, %v380_v11  ;;  %vm389_vm7 = vweird.f32 %v380_v11 }
 0x223   :  { %v356_v16 = vadd.f32 %v2003_v55, %v355_v14 }
 0x224   :  { %v396_v38 = vor.u32 1.1754944e-38, %v395_v29  ;;  %vm394_vm9 = vcmp.eq.f32.partialorder %v393_v32, 8.507059e+37 }
 0x225   :  { %v2377_v17 = vadd.f32 %v356_v16, %v2374_v15 }
 0x227   :  { %v2015_v18 = vpop.eup %2014  ;;  %v1679_v19 = vmul.f32 -1.442695, %v2377_v17 }
 0x228   :  { %v2017_v20 = vpop.eup %2016  ;;  %v381_v22 = vadd.f32 1.0, %v2015_v18 }
 0x229   :  { %2018 = vpow2.f32 %v1679_v19  ;;  %v385_v23 = vmul.f32 %v2017_v20, %v380_v11  ;;  %vm390_vm6 = vweird.f32 %v2017_v20 }
 0x22a   :  { %2020 = vrcp.f32 %v381_v22  ;;  %v357_v24 = vpop.f32.mrf.mxu3  ;;  %vm391_vm8 = vmor %vm389_vm7, %vm390_vm6  ;;  %v410_v43 = vand.u32 2147483648, %v381_v22  ;;  %v408_v45 = vand.u32 2147483647, %v381_v22  ;;  %vm404_vm11 = vweird.f32 %v381_v22 }
 0x22b   :  { %v358_v26 = vadd.f32 %v2003_v55, %v357_v24  ;;  %v386_v27 = vsub.f32 1.0, %v385_v23 }
 0x22c   :  { %v411_v54 = vor.u32 1.1754944e-38, %v410_v43  ;;  %vm409_vm13 = vcmp.eq.f32.partialorder %v408_v45, 8.507059e+37 }
 0x22d   :  { %v2386_v30 = vadd.f32 %v358_v26, %v2380_v25  ;;  %v387_v31 = vmul.f32 %v2017_v20, %v386_v27  ;;  %v1873_v27 = vld [vmem:[%s2851_s7] sm:$0xff] }
 0x22e   :  { %499 = vmatpush.bf16.msrb.mxu0 %v1873_v27 }
 0x22f   :  { %v2019_v33 = vpop.eup %2018  ;;  %v1680_v34 = vmul.f32 -1.442695, %v2386_v30  ;;  %v388_v35 = vadd.f32 %v2017_v20, %v387_v31 }
 0x230   :  { %v2021_v36 = vpop.eup %2020  ;;  %v382_v37 = vadd.f32 1.0, %v2019_v33 }
 0x231   :  { %2022 = vpow2.f32 %v1680_v34  ;;  %v392_v39 = vsel %vm391_vm8, %v2017_v20, %v388_v35  ;;  %v400_v40 = vmul.f32 %v2021_v36, %v381_v22  ;;  %vm405_vm10 = vweird.f32 %v2021_v36 }
 0x232   :  { %2024 = vrcp.f32 %v382_v37  ;;  %v397_v41 = vsel %vm394_vm9, %v396_v38, %v392_v39  ;;  %vm406_vm12 = vmor %vm404_vm11, %vm405_vm10  ;;  %v425_v2 = vand.u32 2147483648, %v382_v37  ;;  %v423_v7 = vand.u32 2147483647, %v382_v37 }
 0x233   :  { %448 = vrot.lane.b32.xlu1 %v397_v41, %s2125_s20  ;;  %v401_v42 = vsub.f32 1.0, %v400_v40  ;;  %vm419_vm15 = vweird.f32 %v382_v37  ;;  %v2004_v41 = vld [vmem:[%s2852_s8] ss:$0 sm:$0xff] }
 0x234   :  { %v426_v10 = vor.u32 1.1754944e-38, %v425_v2  ;;  %vm424_vm2 = vcmp.eq.f32.partialorder %v423_v7, 8.507059e+37 }
 0x235   :  { %v402_v44 = vmul.f32 %v2021_v36, %v401_v42 }
 0x237   :  { %v2023_v46 = vpop.eup %2022  ;;  %v403_v47 = vadd.f32 %v2021_v36, %v402_v44 }
 0x238   :  { %v2025_v50 = vpop.eup %2024  ;;  %v383_v52 = vadd.f32 1.0, %v2023_v46 }
 0x239   :  { %v407_v55 = vsel %vm406_vm12, %v2021_v36, %v403_v47  ;;  %v415_v56 = vmul.f32 %v2025_v50, %v382_v37  ;;  %vm420_vm14 = vweird.f32 %v2025_v50 }
 0x23a   :  { %2026 = vrcp.f32 %v383_v52  ;;  %v412_v60 = vsel %vm409_vm13, %v411_v54, %v407_v55  ;;  %vm421_vm0 = vmor %vm419_vm15, %vm420_vm14  ;;  %v440_v19 = vand.u32 2147483648, %v383_v52  ;;  %v438_v21 = vand.u32 2147483647, %v383_v52 }
 0x23b   :  { %450 = vrot.lane.b32.xlu2 %v412_v60, %s2125_s20  ;;  %v416_v61 = vsub.f32 1.0, %v415_v56  ;;  %vm434_vm7 = vweird.f32 %v383_v52  ;;  %2028 = vtanh.f32 %v2365_v62 }
 0x23c   :  { %v441_v23 = vor.u32 1.1754944e-38, %v440_v19  ;;  %vm439_vm9 = vcmp.eq.f32.partialorder %v438_v21, 8.507059e+37  ;;  %2030 = vtanh.f32 %v2371_v48 }
 0x23d   :  { %v417_v4 = vmul.f32 %v2025_v50, %v416_v61  ;;  %2032 = vtanh.f32 %v2377_v17 }
 0x23e   :  { %2034 = vtanh.f32 %v2386_v30 }
 0x23f   :  { %v418_v8 = vadd.f32 %v2025_v50, %v417_v4 }
 0x240   :  { %v2027_v9 = vpop.eup %2026 }
 0x241   :  { %v422_v11 = vsel %vm421_vm0, %v2025_v50, %v418_v8  ;;  %v430_v14 = vmul.f32 %v2027_v9, %v383_v52  ;;  %vm435_vm6 = vweird.f32 %v2027_v9  ;;  %v2029_v29 = vpop.eup %2028 }
 0x242   :  { %v427_v16 = vsel %vm424_vm2, %v426_v10, %v422_v11  ;;  %vm436_vm8 = vmor %vm434_vm7, %vm435_vm6  ;;  %v2031_v31 = vpop.eup %2030  ;;  %v1878_v10 = vld [vmem:[%s2849_s5 + $0x48] sm:$0xff]  ;;  %v1875_v11 = vld [vmem:[%s2849_s5 + $0x30] sm:$0xff] }
 0x243   :  { %452 = vrot.lane.b32.xlu0 %v427_v16, %s2125_s20  ;;  %v431_v18 = vsub.f32 1.0, %v430_v14  ;;  %v2033_v37 = vpop.eup %2032 }
 0x244   :  { %v2035_v38 = vpop.eup %2034 }
 0x245   :  { %v432_v20 = vmul.f32 %v2027_v9, %v431_v18 }
 0x247   :  { %v433_v22 = vadd.f32 %v2027_v9, %v432_v20 }
 0x249   :  { %v437_v24 = vsel %vm436_vm8, %v2027_v9, %v433_v22 }
 0x24a   :  { %v442_v26 = vsel %vm439_vm9, %v441_v23, %v437_v24 }
 0x24b   :  { %454 = vrot.lane.b32.xlu1 %v442_v26, %s2125_s20 }
 0x295   :  { %v451_v28 = vpop.permute.xlu2 %450 }
 0x296   :  { %v461_v33 = vmul.f32 %v2031_v31, %v451_v28 }
 0x2a5   :  { %v449_v32 = vpop.permute.xlu1 %448 }
 0x2a6   :  { %v460_v34 = vmul.f32 %v2029_v29, %v449_v32 }
 0x2a8   :  { %v464_v35 = vpack.c.bf16 %v461_v33, %v460_v34 }
 0x2aa   :  { %1689 = vmatmul.msk.bf16.vlgmr.msrb.gmra.mxu0 %vm218_vm3, %v464_v35 }
 0x2b5   :  { %v453_v36 = vpop.permute.xlu0 %452 }
 0x2b6   :  { %v462_v62 = vmul.f32 %v2033_v37, %v453_v36 }
 0x2bd   :  { %v455_v39 = vpop.permute.xlu1 %454 }
 0x2be   :  { %v463_v40 = vmul.f32 %v2035_v38, %v455_v39 }
 0x2c0   :  { %v465_v48 = vpack.c.bf16 %v463_v40, %v462_v62 }
 0x2c2   :  { %1690 = vmatmul.msk.bf16.gmra.mxu0 %vm218_vm3, %v465_v48 }
 0x327   :  { %v501_v42 = vpop.f32.mrf.mxu0 }
 0x328   :  { %v2405_v43 = vadd.f32 %v2004_v41, %v501_v42  ;;  %v2485_v42 = vpop.f32.mrf.mxu1 }
 0x32a   :  { %v511_v17 = vadd.f32 %v2405_v43, %v2294_v58 }
 0x32c   :  { %v2410_v30 = vmul.f32 %v511_v17, %v2288_v53  ;;  %v2005_v17 = vld [vmem:[%s2850_s6 + $0x1] ss:$0 sm:$0xff] }
 0x32e   :  { %523 = vst.msk [vmem:[#allocation2 + $0x8] sm:$0xff] %vm218_vm3, %v2410_v30 }
 0x32f   :  { %v503_v44 = vpop.f32.mrf.mxu0 }
 0x330   :  { %v2414_v45 = vadd.f32 %v2004_v41, %v503_v44 }
 0x332   :  { %v512_v46 = vadd.f32 %v2414_v45, %v2307_v1 }
 0x334   :  { %v2419_v47 = vmul.f32 %v512_v46, %v2301_v63 }
 0x335   :  { %v527_v20 = vld [vmem:[#allocation2 + $0x6] sm:$0xff] }
 0x336   :  { %524 = vst.msk [vmem:[#allocation2 + $0x10] sm:$0xff] %vm218_vm3, %v2419_v47  ;;  %v1942_v58 = vpack.i.bf16 %v2419_v47, %v2410_v30 }
 0x338   :  { %1943 = vrot.lane.b32.xlu2 %v1942_v58, %s2123_s23 }
 0x33d   :  { %v531_v50 = vld [vmem:[#allocation2 + $0xa] sm:$0xff]  ;;  %v532_v52 = vld [vmem:[#allocation2 + $0x12] sm:$0xff] }
 0x33e   :  { %v1947_v54 = vpack.i.bf16 %v532_v52, %v531_v50  ;;  %v528_v21 = vld [vmem:[#allocation2 + $0xe] sm:$0xff] }
 0x33f   :  { %v506_v55 = vpop.f32.mrf.mxu0 }
 0x340   :  { %v2426_v56 = vadd.f32 %v2004_v41, %v506_v55  ;;  %1948 = vrot.lane.b32.xlu0 %v1947_v54, %s2124_s24 }
 0x342   :  { %v513_v1 = vadd.f32 %v2426_v56, %v2317_v6 }
 0x344   :  { %v2432_v60 = vmul.f32 %v513_v1, %v2314_v3 }
 0x346   :  { %525 = vst.msk [vmem:[#allocation2 + $0x28] sm:$0xff] %vm218_vm3, %v2432_v60 }
 0x347   :  { %v508_v61 = vpop.f32.mrf.mxu0 }
 0x348   :  { %v2436_v2 = vadd.f32 %v2004_v41, %v508_v61  ;;  %660 = vrot.lane.b32.xlu0 %v2362_v59, %s2124_s24 }
 0x34a   :  { %v514_v4 = vadd.f32 %v2436_v2, %v2325_v13  ;;  %v1880_v13 = vld [vmem:[%s2849_s5 + $0x58] sm:$0xff] }
 0x34b   :  { %639 = vmatpush.bf16.msrb.mxu1 %v1880_v13 }
 0x34c   :  { %v2443_v7 = vmul.f32 %v514_v4, %v2322_v12 }
 0x34d   :  { %v529_v37 = vld [vmem:[#allocation2 + $0x26] sm:$0xff] }
 0x34e   :  { %526 = vst.msk [vmem:[#allocation2 + $0x30] sm:$0xff] %vm218_vm3, %v2443_v7  ;;  %v1952_v6 = vpack.i.bf16 %v2443_v7, %v2432_v60 }
 0x350   :  { %1953 = vrot.lane.b32.xlu1 %v1952_v6, %s2123_s23  ;;  %666 = vrot.lane.b32.xlu0 %v2380_v25, %s2124_s24  ;;  %v1879_v25 = vld [vmem:[%s2849_s5 + $0x50] sm:$0xff] }
 0x351   :  { %640 = vmatpush.bf16.msrb.mxu1 %v1879_v25 }
 0x355   :  { %v533_v8 = vld [vmem:[#allocation2 + $0x2a] sm:$0xff]  ;;  %v534_v9 = vld [vmem:[#allocation2 + $0x32] sm:$0xff]  ;;  %641 = vmatpush.bf16.msrb.mxu1 %v1878_v10 }
 0x356   :  { %v1957_v59 = vpack.i.bf16 %v534_v9, %v533_v8  ;;  %v530_v38 = vld [vmem:[#allocation2 + $0x2e] sm:$0xff] }
 0x358   :  { %662 = vrot.lane.b32.xlu1 %v2368_v5, %s2124_s24  ;;  %1958 = vrot.lane.b32.xlu2 %v1957_v59, %s2124_s24  ;;  %v1877_v5 = vld [vmem:[%s2849_s5 + $0x40] sm:$0xff] }
 0x359   :  { %642 = vmatpush.bf16.msrb.mxu1 %v1877_v5 }
 0x360   :  { %664 = vrot.lane.b32.xlu2 %v2374_v15, %s2124_s24  ;;  %v1876_v15 = vld [vmem:[%s2849_s5 + $0x38] sm:$0xff] }
 0x361   :  { %643 = vmatpush.bf16.msrb.mxu1 %v1876_v15 }
 0x365   :  { %644 = vmatpush.bf16.msrb.mxu1 %v1875_v11 }
 0x392   :  { %v1944_v14 = vpop.permute.xlu2 %1943 }
 0x393   :  { %v1946_v16 = vunpack.i.h.bf16 %v1944_v14  ;;  %v1945_v18 = vunpack.i.l.bf16 %v1944_v14 }
 0x395   :  { %v567_v24 = vsel %vm218_vm3, %v527_v20, %v1945_v18  ;;  %v568_v26 = vsel %vm218_vm3, %v528_v21, %v1946_v16  ;;  %v1882_v21 = vld [vmem:[%s2851_s7 + $0x18] sm:$0xff] }
 0x396   :  { %812 = vmatpush.bf16.msrb.mxu2 %v1882_v21  ;;  %v1881_v21 = vld [vmem:[%s2851_s7 + $0x10] sm:$0xff] }
 0x39a   :  { %813 = vmatpush.bf16.msrb.mxu2 %v1881_v21 }
 0x3b2   :  { %v1949_v19 = vpop.permute.xlu0 %1948  ;;  %v1959_v31 = vpop.permute.xlu2 %1958 }
 0x3b3   :  { %v1951_v22 = vunpack.i.h.bf16 %v1949_v19  ;;  %v1950_v23 = vunpack.i.l.bf16 %v1949_v19  ;;  %v1961_v35 = vunpack.i.h.bf16 %v1959_v31  ;;  %v1960_v36 = vunpack.i.l.bf16 %v1959_v31 }
 0x3b5   :  { %v571_v27 = vsel %vm275_vm4, %v567_v24, %v1950_v23  ;;  %v572_v28 = vsel %vm275_vm4, %v568_v26, %v1951_v22 }
 0x3b6   :  { %v575_v29 = vpack.c.bf16 %v572_v28, %v571_v27 }
 0x3b8   :  { %1728 = vmatmul.msk.bf16.vlgmr.msrb.gmra.mxu1 %vm334_vm5, %v575_v29 }
 0x3ba   :  { %v661_v58 = vpop.permute.xlu0 %660  ;;  %v665_v13 = vpop.permute.xlu2 %664 }
 0x3c2   :  { %v1954_v32 = vpop.permute.xlu1 %1953  ;;  %v667_v22 = vpop.permute.xlu0 %666 }
 0x3c3   :  { %v1956_v33 = vunpack.i.h.bf16 %v1954_v32  ;;  %v1955_v34 = vunpack.i.l.bf16 %v1954_v32 }
 0x3c5   :  { %v569_v39 = vsel %vm218_vm3, %v529_v37, %v1955_v34  ;;  %v570_v62 = vsel %vm218_vm3, %v530_v38, %v1956_v33 }
 0x3c6   :  { %v573_v40 = vsel %vm275_vm4, %v569_v39, %v1960_v36  ;;  %v574_v48 = vsel %vm275_vm4, %v570_v62, %v1961_v35 }
 0x3c7   :  { %v576_v41 = vpack.c.bf16 %v574_v48, %v573_v40 }
 0x3c9   :  { %1729 = vmatmul.msk.bf16.gmra.mxu1 %vm334_vm5, %v576_v41 }
 0x3ca   :  { %v663_v1 = vpop.permute.xlu1 %662 }
 0x435   :  { %v646_v44 = vpop.f32.mrf.mxu1 }
 0x436   :  { %v647_v46 = vadd.f32 %v2005_v17, %v646_v44 }
 0x438   :  { %v2490_v50 = vadd.f32 %v661_v58, %v647_v46 }
 0x43a   :  { %v1730_v52 = vmul.f32 -1.442695, %v2490_v50 }
 0x43c   :  { %2036 = vpow2.f32 %v1730_v52 }
 0x43d   :  { %v648_v54 = vpop.f32.mrf.mxu1 }
 0x43e   :  { %v649_v55 = vadd.f32 %v2005_v17, %v648_v54 }
 0x440   :  { %v2493_v61 = vadd.f32 %v663_v1, %v649_v55 }
 0x442   :  { %v2037_v4 = vpop.eup %2036  ;;  %v1731_v6 = vmul.f32 -1.442695, %v2493_v61 }
 0x443   :  { %v692_v8 = vadd.f32 1.0, %v2037_v4 }
 0x444   :  { %2038 = vpow2.f32 %v1731_v6 }
 0x445   :  { %2040 = vrcp.f32 %v692_v8  ;;  %v707_v20 = vand.u32 2147483648, %v692_v8  ;;  %v705_v24 = vand.u32 2147483647, %v692_v8  ;;  %vm701_vm11 = vweird.f32 %v692_v8 }
 0x446   :  { %v651_v9 = vpop.f32.mrf.mxu1 }
 0x447   :  { %v652_v59 = vadd.f32 %v2005_v17, %v651_v9  ;;  %v708_v31 = vor.u32 1.1754944e-38, %v707_v20  ;;  %vm706_vm13 = vcmp.eq.f32.partialorder %v705_v24, 8.507059e+37 }
 0x449   :  { %v2496_v25 = vadd.f32 %v665_v13, %v652_v59 }
 0x44a   :  { %v2039_v10 = vpop.eup %2038 }
 0x44b   :  { %v2041_v5 = vpop.eup %2040  ;;  %v693_v15 = vadd.f32 1.0, %v2039_v10  ;;  %v1732_v11 = vmul.f32 -1.442695, %v2496_v25 }
 0x44c   :  { %v697_v14 = vmul.f32 %v2041_v5, %v692_v8  ;;  %vm702_vm10 = vweird.f32 %v2041_v5 }
 0x44d   :  { %2042 = vrcp.f32 %v693_v15  ;;  %vm703_vm12 = vmor %vm701_vm11, %vm702_vm10  ;;  %v722_v38 = vand.u32 2147483648, %v693_v15  ;;  %v720_v62 = vand.u32 2147483647, %v693_v15  ;;  %vm716_vm15 = vweird.f32 %v693_v15 }
 0x44e   :  { %2044 = vpow2.f32 %v1732_v11  ;;  %v653_v16 = vpop.f32.mrf.mxu1  ;;  %v698_v18 = vsub.f32 1.0, %v697_v14 }
 0x44f   :  { %v654_v19 = vadd.f32 %v2005_v17, %v653_v16  ;;  %v723_v41 = vor.u32 1.1754944e-38, %v722_v38  ;;  %vm721_vm2 = vcmp.eq.f32.partialorder %v720_v62, 8.507059e+37 }
 0x450   :  { %v699_v23 = vmul.f32 %v2041_v5, %v698_v18 }
 0x451   :  { %v2502_v26 = vadd.f32 %v667_v22, %v654_v19 }
 0x452   :  { %v700_v27 = vadd.f32 %v2041_v5, %v699_v23 }
 0x453   :  { %v2043_v28 = vpop.eup %2042  ;;  %v1733_v29 = vmul.f32 -1.442695, %v2502_v26 }
 0x454   :  { %v2045_v32 = vpop.eup %2044  ;;  %v704_v33 = vsel %vm703_vm12, %v2041_v5, %v700_v27  ;;  %v712_v34 = vmul.f32 %v2043_v28, %v693_v15  ;;  %vm717_vm14 = vweird.f32 %v2043_v28 }
 0x455   :  { %v694_v35 = vadd.f32 1.0, %v2045_v32  ;;  %2046 = vpow2.f32 %v1733_v29  ;;  %v709_v36 = vsel %vm706_vm13, %v708_v31, %v704_v33  ;;  %vm718_vm0 = vmor %vm716_vm15, %vm717_vm14 }
 0x456   :  { %760 = vrot.lane.b32.xlu1 %v709_v36, %s2125_s20  ;;  %v713_v37 = vsub.f32 1.0, %v712_v34 }
 0x457   :  { %2048 = vrcp.f32 %v694_v35  ;;  %v737_v55 = vand.u32 2147483648, %v694_v35  ;;  %v735_v4 = vand.u32 2147483647, %v694_v35  ;;  %vm731_vm7 = vweird.f32 %v694_v35 }
 0x458   :  { %v714_v39 = vmul.f32 %v2043_v28, %v713_v37  ;;  %v2006_v37 = vld [vmem:[%s2852_s8 + $0x1] ss:$0 sm:$0xff] }
 0x459   :  { %v738_v9 = vor.u32 1.1754944e-38, %v737_v55  ;;  %vm736_vm9 = vcmp.eq.f32.partialorder %v735_v4, 8.507059e+37 }
 0x45a   :  { %v715_v40 = vadd.f32 %v2043_v28, %v714_v39 }
 0x45b   :  { %v2047_v48 = vpop.eup %2046 }
 0x45c   :  { %v695_v17 = vadd.f32 1.0, %v2047_v48  ;;  %v719_v44 = vsel %vm718_vm0, %v2043_v28, %v715_v40 }
 0x45d   :  { %v2049_v46 = vpop.eup %2048  ;;  %v724_v58 = vsel %vm721_vm2, %v723_v41, %v719_v44 }
 0x45e   :  { %2050 = vrcp.f32 %v695_v17  ;;  %762 = vrot.lane.b32.xlu2 %v724_v58, %s2125_s20  ;;  %v727_v52 = vmul.f32 %v2049_v46, %v694_v35  ;;  %vm732_vm6 = vweird.f32 %v2049_v46  ;;  %v752_v15 = vand.u32 2147483648, %v695_v17 }
 0x45f   :  { %vm733_vm8 = vmor %vm731_vm7, %vm732_vm6  ;;  %v750_v14 = vand.u32 2147483647, %v695_v17  ;;  %vm746_vm11 = vweird.f32 %v695_v17  ;;  %2052 = vtanh.f32 %v2490_v50 }
 0x460   :  { %v728_v54 = vsub.f32 1.0, %v727_v52  ;;  %v753_v18 = vor.u32 1.1754944e-38, %v752_v15  ;;  %2054 = vtanh.f32 %v2493_v61  ;;  %v1884_v15 = vld [vmem:[%s2849_s5 + $0x68] sm:$0xff] }
 0x461   :  { %vm751_vm13 = vcmp.eq.f32.partialorder %v750_v14, 8.507059e+37  ;;  %2056 = vtanh.f32 %v2496_v25 }
 0x462   :  { %v729_v1 = vmul.f32 %v2049_v46, %v728_v54  ;;  %2058 = vtanh.f32 %v2502_v26 }
 0x464   :  { %v2051_v6 = vpop.eup %2050  ;;  %v730_v8 = vadd.f32 %v2049_v46, %v729_v1 }
 0x465   :  { %v742_v59 = vmul.f32 %v2051_v6, %v695_v17  ;;  %vm747_vm10 = vweird.f32 %v2051_v6  ;;  %v2053_v23 = vpop.eup %2052 }
 0x466   :  { %v734_v13 = vsel %vm733_vm8, %v2049_v46, %v730_v8  ;;  %vm748_vm12 = vmor %vm746_vm11, %vm747_vm10  ;;  %v2055_v24 = vpop.eup %2054 }
 0x467   :  { %v739_v10 = vsel %vm736_vm9, %v738_v9, %v734_v13  ;;  %v743_v5 = vsub.f32 1.0, %v742_v59  ;;  %v2057_v33 = vpop.eup %2056  ;;  %v1887_v13 = vld [vmem:[%s2849_s5 + $0x80] sm:$0xff] }
 0x468   :  { %764 = vrot.lane.b32.xlu0 %v739_v10, %s2125_s20  ;;  %v2059_v34 = vpop.eup %2058  ;;  %v1886_v10 = vld [vmem:[%s2849_s5 + $0x78] sm:$0xff] }
 0x469   :  { %v744_v11 = vmul.f32 %v2051_v6, %v743_v5  ;;  %v1885_v5 = vld [vmem:[%s2849_s5 + $0x70] sm:$0xff] }
 0x46b   :  { %v745_v16 = vadd.f32 %v2051_v6, %v744_v11  ;;  %v1883_v11 = vld [vmem:[%s2849_s5 + $0x60] sm:$0xff] }
 0x46d   :  { %v749_v19 = vsel %vm748_vm12, %v2051_v6, %v745_v16 }
 0x46e   :  { %v754_v20 = vsel %vm751_vm13, %v753_v18, %v749_v19 }
 0x46f   :  { %766 = vrot.lane.b32.xlu1 %v754_v20, %s2125_s20 }
 0x4b8   :  { %v763_v22 = vpop.permute.xlu2 %762 }
 0x4b9   :  { %v773_v28 = vmul.f32 %v2055_v24, %v763_v22 }
 0x4c8   :  { %v761_v27 = vpop.permute.xlu1 %760 }
 0x4c9   :  { %v772_v29 = vmul.f32 %v2053_v23, %v761_v27 }
 0x4cb   :  { %v776_v31 = vpack.c.bf16 %v773_v28, %v772_v29 }
 0x4cd   :  { %1747 = vmatmul.msk.bf16.vlgmr.msrb.gmra.mxu2 %vm218_vm3, %v776_v31 }
 0x4da   :  { %v765_v32 = vpop.permute.xlu0 %764 }
 0x4db   :  { %v774_v50 = vmul.f32 %v2057_v33, %v765_v32 }
 0x4e1   :  { %v767_v35 = vpop.permute.xlu1 %766 }
 0x4e2   :  { %v775_v36 = vmul.f32 %v2059_v34, %v767_v35 }
 0x4e4   :  { %v777_v61 = vpack.c.bf16 %v775_v36, %v774_v50 }
 0x4e6   :  { %1748 = vmatmul.msk.bf16.gmra.mxu2 %vm218_vm3, %v777_v61 }
 0x550   :  { %v815_v38 = vpop.f32.mrf.mxu2 }
 0x551   :  { %v2521_v39 = vadd.f32 %v2006_v37, %v815_v38 }
 0x553   :  { %v825_v25 = vadd.f32 %v2521_v39, %v2410_v30 }
 0x555   :  { %v2526_v26 = vmul.f32 %v825_v25, %v2288_v53 }
 0x557   :  { %837 = vst.msk [vmem:[#allocation2 + $0x8] sm:$0xff] %vm218_vm3, %v2526_v26 }
 0x558   :  { %v817_v62 = vpop.f32.mrf.mxu2 }
 0x559   :  { %v2530_v40 = vadd.f32 %v2006_v37, %v817_v62 }
 0x55b   :  { %v826_v48 = vadd.f32 %v2530_v40, %v2419_v47 }
 0x55d   :  { %v2535_v41 = vmul.f32 %v826_v48, %v2301_v63  ;;  %v2007_v48 = vld [vmem:[%s2850_s6 + $0x2] ss:$0 sm:$0xff] }
 0x55e   :  { %v841_v20 = vld [vmem:[#allocation2 + $0x4] sm:$0xff] }
 0x55f   :  { %838 = vst.msk [vmem:[#allocation2 + $0x10] sm:$0xff] %vm218_vm3, %v2535_v41  ;;  %v1962_v30 = vpack.i.bf16 %v2535_v41, %v2526_v26 }
 0x561   :  { %1963 = vrot.lane.b32.xlu2 %v1962_v30, %s2123_s23 }
 0x566   :  { %v842_v17 = vld [vmem:[#allocation2 + $0xc] sm:$0xff]  ;;  %v845_v44 = vld [vmem:[#allocation2 + $0x14] sm:$0xff] }
 0x567   :  { %v1967_v46 = vpack.i.bf16 %v845_v44, %v842_v17 }
 0x569   :  { %v820_v58 = vpop.f32.mrf.mxu2  ;;  %1968 = vrot.lane.b32.xlu0 %v1967_v46, %s2124_s24 }
 0x56a   :  { %v2543_v52 = vadd.f32 %v2006_v37, %v820_v58 }
 0x56c   :  { %v827_v47 = vadd.f32 %v2543_v52, %v2432_v60 }
 0x56e   :  { %v2548_v54 = vmul.f32 %v827_v47, %v2314_v3 }
 0x570   :  { %839 = vst.msk [vmem:[#allocation2 + $0x28] sm:$0xff] %vm218_vm3, %v2548_v54 }
 0x571   :  { %v822_v55 = vpop.f32.mrf.mxu2 }
 0x572   :  { %v2552_v1 = vadd.f32 %v2006_v37, %v822_v55 }
 0x574   :  { %v828_v4 = vadd.f32 %v2552_v1, %v2443_v7  ;;  %v1888_v7 = vld [vmem:[%s2849_s5 + $0x88] sm:$0xff] }
 0x575   :  { %951 = vmatpush.bf16.msrb.mxu3 %v1888_v7 }
 0x576   :  { %v2557_v6 = vmul.f32 %v828_v4, %v2322_v12 }
 0x577   :  { %v843_v36 = vld [vmem:[#allocation2 + $0x24] sm:$0xff] }
 0x578   :  { %840 = vst.msk [vmem:[#allocation2 + $0x30] sm:$0xff] %vm218_vm3, %v2557_v6  ;;  %v1972_v60 = vpack.i.bf16 %v2557_v6, %v2548_v54 }
 0x579   :  { %952 = vmatpush.bf16.msrb.mxu3 %v1887_v13 }
 0x57a   :  { %1973 = vrot.lane.b32.xlu1 %v1972_v60, %s2123_s23 }
 0x57d   :  { %953 = vmatpush.bf16.msrb.mxu3 %v1886_v10 }
 0x57f   :  { %v844_v8 = vld [vmem:[#allocation2 + $0x2c] sm:$0xff]  ;;  %v846_v9 = vld [vmem:[#allocation2 + $0x34] sm:$0xff] }
 0x580   :  { %v1977_v59 = vpack.i.bf16 %v846_v9, %v844_v8 }
 0x581   :  { %954 = vmatpush.bf16.msrb.mxu3 %v1885_v5 }
 0x582   :  { %1978 = vrot.lane.b32.xlu2 %v1977_v59, %s2124_s24 }
 0x585   :  { %955 = vmatpush.bf16.msrb.mxu3 %v1884_v15 }
 0x589   :  { %956 = vmatpush.bf16.msrb.mxu3 %v1883_v11 }
 0x5bb   :  { %v1964_v14 = vpop.permute.xlu2 %1963 }
 0x5bc   :  { %v1966_v16 = vunpack.i.h.bf16 %v1964_v14  ;;  %v1965_v18 = vunpack.i.l.bf16 %v1964_v14 }
 0x5be   :  { %v879_v23 = vsel %vm218_vm3, %v841_v20, %v1965_v18  ;;  %v880_v24 = vsel %vm218_vm3, %v842_v17, %v1966_v16  ;;  %v2610_v16 = vadd.f32 %v2485_v42, %v2282_v49 }
 0x5db   :  { %v1969_v19 = vpop.permute.xlu0 %1968 }
 0x5dc   :  { %v1971_v21 = vunpack.i.h.bf16 %v1969_v19  ;;  %v1970_v22 = vunpack.i.l.bf16 %v1969_v19  ;;  %v1979_v31 = vpop.permute.xlu2 %1978 }
 0x5dd   :  { %v1981_v35 = vunpack.i.h.bf16 %v1979_v31  ;;  %v1980_v50 = vunpack.i.l.bf16 %v1979_v31 }
 0x5de   :  { %v883_v27 = vsel %vm275_vm4, %v879_v23, %v1970_v22  ;;  %v884_v28 = vsel %vm275_vm4, %v880_v24, %v1971_v21  ;;  %v1890_v23 = vld [vmem:[%s2851_s7 + $0x28] sm:$0xff] }
 0x5df   :  { %v887_v29 = vpack.c.bf16 %v884_v28, %v883_v27  ;;  %1108 = vmatpush.bf16.msra.mxu0 %v1890_v23  ;;  %v1889_v23 = vld [vmem:[%s2851_s7 + $0x20] sm:$0xff] }
 0x5e1   :  { %1786 = vmatmul.msk.bf16.vlgmr.msrb.gmra.mxu3 %vm334_vm5, %v887_v29 }
 0x5e3   :  { %1109 = vmatpush.bf16.msra.mxu0 %v1889_v23 }
 0x5ec   :  { %v1974_v32 = vpop.permute.xlu1 %1973 }
 0x5ed   :  { %v1976_v33 = vunpack.i.h.bf16 %v1974_v32  ;;  %v1975_v34 = vunpack.i.l.bf16 %v1974_v32 }
 0x5ef   :  { %v881_v61 = vsel %vm218_vm3, %v843_v36, %v1975_v34  ;;  %v882_v37 = vsel %vm218_vm3, %v844_v8, %v1976_v33 }
 0x5f0   :  { %v885_v38 = vsel %vm275_vm4, %v881_v61, %v1980_v50  ;;  %v886_v25 = vsel %vm275_vm4, %v882_v37, %v1981_v35 }
 0x5f1   :  { %v888_v62 = vpack.c.bf16 %v886_v25, %v885_v38 }
 0x5f3   :  { %1787 = vmatmul.msk.bf16.gmra.mxu3 %vm334_vm5, %v888_v62 }
 0x664   :  { %v958_v30 = vpop.f32.mrf.mxu3 }
 0x665   :  { %v959_v17 = vadd.f32 %v2007_v48, %v958_v30 }
 0x667   :  { %v2597_v44 = vadd.f32 %v959_v17, %v2285_v51 }
 0x669   :  { %v1788_v46 = vmul.f32 -1.442695, %v2597_v44 }
 0x66b   :  { %2060 = vpow2.f32 %v1788_v46 }
 0x66c   :  { %v960_v58 = vpop.f32.mrf.mxu3 }
 0x66d   :  { %v961_v47 = vadd.f32 %v2007_v48, %v960_v58 }
 0x66f   :  { %v2601_v55 = vadd.f32 %v961_v47, %v2291_v57 }
 0x671   :  { %v2061_v4 = vpop.eup %2060  ;;  %v1789_v60 = vmul.f32 -1.442695, %v2601_v55 }
 0x672   :  { %v988_v8 = vadd.f32 1.0, %v2061_v4 }
 0x673   :  { %2062 = vpow2.f32 %v1789_v60 }
 0x674   :  { %2064 = vrcp.f32 %v988_v8  ;;  %v1003_v19 = vand.u32 2147483648, %v988_v8  ;;  %v1001_v22 = vand.u32 2147483647, %v988_v8  ;;  %vm997_vm15 = vweird.f32 %v988_v8 }
 0x676   :  { %v963_v9 = vpop.f32.mrf.mxu3  ;;  %v1004_v49 = vor.u32 1.1754944e-38, %v1003_v19  ;;  %vm1002_vm2 = vcmp.eq.f32.partialorder %v1001_v22, 8.507059e+37 }
 0x677   :  { %v964_v59 = vadd.f32 %v2007_v48, %v963_v9 }
 0x679   :  { %v2063_v7 = vpop.eup %2062  ;;  %v2605_v13 = vadd.f32 %v964_v59, %v2304_v0 }
 0x67a   :  { %v2065_v10 = vpop.eup %2064  ;;  %v989_v5 = vadd.f32 1.0, %v2063_v7 }
 0x67b   :  { %v1790_v15 = vmul.f32 -1.442695, %v2605_v13  ;;  %v993_v11 = vmul.f32 %v2065_v10, %v988_v8  ;;  %vm998_vm14 = vweird.f32 %v2065_v10 }
 0x67c   :  { %2066 = vrcp.f32 %v989_v5  ;;  %vm999_vm0 = vmor %vm997_vm15, %vm998_vm14  ;;  %v1018_v50 = vand.u32 2147483648, %v989_v5  ;;  %v1016_v61 = vand.u32 2147483647, %v989_v5  ;;  %vm1012_vm7 = vweird.f32 %v989_v5 }
 0x67d   :  { %2068 = vpow2.f32 %v1790_v15  ;;  %v994_v14 = vsub.f32 1.0, %v993_v11 }
 0x67e   :  { %v965_v18 = vpop.f32.mrf.mxu3  ;;  %v1019_v38 = vor.u32 1.1754944e-38, %v1018_v50  ;;  %vm1017_vm9 = vcmp.eq.f32.partialorder %v1016_v61, 8.507059e+37  ;;  %v2008_v61 = vld [vmem:[%s2852_s8 + $0x2] ss:$0 sm:$0xff] }
 0x67f   :  { %v966_v20 = vadd.f32 %v2007_v48, %v965_v18  ;;  %v995_v21 = vmul.f32 %v2065_v10, %v994_v14 }
 0x681   :  { %v2616_v24 = vadd.f32 %v966_v20, %v2610_v16  ;;  %v996_v27 = vadd.f32 %v2065_v10, %v995_v21 }
 0x682   :  { %v2067_v28 = vpop.eup %2066 }
 0x683   :  { %v2069_v42 = vpop.eup %2068  ;;  %v1791_v29 = vmul.f32 -1.442695, %v2616_v24  ;;  %v1000_v31 = vsel %vm999_vm0, %v2065_v10, %v996_v27  ;;  %v1008_v32 = vmul.f32 %v2067_v28, %v989_v5  ;;  %vm1013_vm6 = vweird.f32 %v2067_v28 }
 0x684   :  { %v990_v33 = vadd.f32 1.0, %v2069_v42  ;;  %v1005_v34 = vsel %vm1002_vm2, %v1004_v49, %v1000_v31  ;;  %vm1014_vm8 = vmor %vm1012_vm7, %vm1013_vm6 }
 0x685   :  { %2070 = vpow2.f32 %v1791_v29  ;;  %1056 = vrot.lane.b32.xlu0 %v1005_v34, %s2125_s20  ;;  %v1009_v35 = vsub.f32 1.0, %v1008_v32 }
 0x686   :  { %2072 = vrcp.f32 %v990_v33  ;;  %v1033_v47 = vand.u32 2147483648, %v990_v33  ;;  %v1031_v60 = vand.u32 2147483647, %v990_v33  ;;  %vm1027_vm11 = vweird.f32 %v990_v33 }
 0x687   :  { %v1010_v36 = vmul.f32 %v2067_v28, %v1009_v35 }
 0x688   :  { %v1034_v59 = vor.u32 1.1754944e-38, %v1033_v47  ;;  %vm1032_vm13 = vcmp.eq.f32.partialorder %v1031_v60, 8.507059e+37  ;;  %v835_v47 = vadd.f32 %v2543_v52, %v2426_v56  ;;  %v836_v52 = vadd.f32 %v2552_v1, %v2436_v2  ;;  %v1894_v1 = vld [vmem:[%s2849_s5 + $0xa8] sm:$0xff] }
 0x689   :  { %v1011_v37 = vadd.f32 %v2067_v28, %v1010_v36 }
 0x68b   :  { %v2071_v25 = vpop.eup %2070  ;;  %v1015_v62 = vsel %vm1014_vm8, %v2067_v28, %v1011_v37 }
 0x68c   :  { %v2073_v48 = vpop.eup %2072  ;;  %v991_v30 = vadd.f32 1.0, %v2071_v25  ;;  %v1020_v17 = vsel %vm1017_vm9, %v1019_v38, %v1015_v62  ;;  %v833_v38 = vadd.f32 %v2521_v39, %v2405_v43 }
 0x68d   :  { %1058 = vrot.lane.b32.xlu1 %v1020_v17, %s2125_s20  ;;  %v1023_v46 = vmul.f32 %v2073_v48, %v990_v33  ;;  %vm1028_vm10 = vweird.f32 %v2073_v48 }
 0x68e   :  { %2074 = vrcp.f32 %v991_v30  ;;  %vm1029_vm12 = vmor %vm1027_vm11, %vm1028_vm10  ;;  %v1048_v11 = vand.u32 2147483648, %v991_v30  ;;  %v1046_v18 = vand.u32 2147483647, %v991_v30  ;;  %vm1042_vm15 = vweird.f32 %v991_v30 }
 0x68f   :  { %v1024_v58 = vsub.f32 1.0, %v1023_v46  ;;  %2076 = vtanh.f32 %v2597_v44 }
 0x690   :  { %v1049_v20 = vor.u32 1.1754944e-38, %v1048_v11  ;;  %vm1047_vm2 = vcmp.eq.f32.partialorder %v1046_v18, 8.507059e+37  ;;  %2078 = vtanh.f32 %v2601_v55  ;;  %v1144_v11 = vld [vmem:[#allocation2 + $0x38] sm:$0xff]  ;;  %v1137_v18 = vld [vmem:[#allocation2] sm:$0xff] }
 0x691   :  { %v1025_v4 = vmul.f32 %v2073_v48, %v1024_v58  ;;  %2080 = vtanh.f32 %v2605_v13 }
 0x692   :  { %2082 = vtanh.f32 %v2616_v24 }
 0x693   :  { %v1026_v8 = vadd.f32 %v2073_v48, %v1025_v4 }
 0x694   :  { %v2075_v9 = vpop.eup %2074 }
 0x695   :  { %v1030_v7 = vsel %vm1029_vm12, %v2073_v48, %v1026_v8  ;;  %v1038_v10 = vmul.f32 %v2075_v9, %v991_v30  ;;  %vm1043_vm14 = vweird.f32 %v2075_v9  ;;  %v2077_v28 = vpop.eup %2076  ;;  %v834_v30 = vadd.f32 %v2530_v40, %v2414_v45  ;;  %v1896_v45 = vld [vmem:[%s2849_s5 + $0xb8] sm:$0xff] }
 0x696   :  { %v1035_v5 = vsel %vm1032_vm13, %v1034_v59, %v1030_v7  ;;  %vm1044_vm0 = vmor %vm1042_vm15, %vm1043_vm14  ;;  %v2079_v49 = vpop.eup %2078  ;;  %v1142_v40 = vld [vmem:[#allocation2 + $0x18] sm:$0xff]  ;;  %1249 = vmatpush.bf16.msra.mxu1 %v1896_v45 }
 0x697   :  { %1060 = vrot.lane.b32.xlu2 %v1035_v5, %s2125_s20  ;;  %v1039_v15 = vsub.f32 1.0, %v1038_v10  ;;  %v2081_v34 = vpop.eup %2080 }
 0x698   :  { %v2083_v35 = vpop.eup %2082 }
 0x699   :  { %v1040_v14 = vmul.f32 %v2075_v9, %v1039_v15 }
 0x69b   :  { %v1041_v19 = vadd.f32 %v2075_v9, %v1040_v14 }
 0x69d   :  { %v1045_v21 = vsel %vm1044_vm0, %v2075_v9, %v1041_v19 }
 0x69e   :  { %v1050_v22 = vsel %vm1047_vm2, %v1049_v20, %v1045_v21 }
 0x69f   :  { %1062 = vrot.lane.b32.xlu0 %v1050_v22, %s2125_s20 }
 0x6f1   :  { %v1061_v33 = vpop.permute.xlu2 %1060 }
 0x6f2   :  { %v1070_v44 = vmul.f32 %v2081_v34, %v1061_v33 }
 0x6f7   :  { %v1057_v27 = vpop.permute.xlu0 %1056 }
 0x6f8   :  { %v1068_v29 = vmul.f32 %v2077_v28, %v1057_v27 }
 0x6ff   :  { %v1059_v42 = vpop.permute.xlu1 %1058 }
 0x700   :  { %v1069_v31 = vmul.f32 %v2079_v49, %v1059_v42 }
 0x702   :  { %v1072_v32 = vpack.c.bf16 %v1069_v31, %v1068_v29 }
 0x704   :  { %1805 = vmatmul.msk.bf16.vlgmr.msra.gmra.mxu0 %vm218_vm3, %v1072_v32 }
 0x711   :  { %v1063_v50 = vpop.permute.xlu0 %1062 }
 0x712   :  { %v1071_v36 = vmul.f32 %v2083_v35, %v1063_v50  ;;  %v1139_v35 = vld [vmem:[#allocation2 + $0x20] sm:$0xff] }
 0x714   :  { %v1073_v55 = vpack.c.bf16 %v1071_v36, %v1070_v44 }
 0x716   :  { %1806 = vmatmul.msk.bf16.gmra.mxu0 %vm218_vm3, %v1073_v55 }
 0x781   :  { %v1111_v37 = vpop.f32.mrf.mxu0 }
 0x782   :  { %v1112_v13 = vadd.f32 %v2008_v61, %v1111_v37 }
 0x784   :  { %v1121_v24 = vadd.f32 %v1112_v13, %v2526_v26  ;;  %v2638_v25 = vadd.f32 %v1112_v13, %v833_v38 }
 0x786   :  { %v1125_v62 = vmul.f32 %v1121_v24, %v2288_v53 }
 0x788   :  { %1133 = vst.msk [vmem:[#allocation2 + $0x8] sm:$0xff] %vm218_vm3, %v1125_v62 }
 0x789   :  { %v1113_v48 = vpop.f32.mrf.mxu0 }
 0x78a   :  { %v1114_v17 = vadd.f32 %v2008_v61, %v1113_v48 }
 0x78c   :  { %v1122_v46 = vadd.f32 %v1114_v17, %v2535_v41  ;;  %v2645_v58 = vadd.f32 %v1114_v17, %v834_v30 }
 0x78e   :  { %v1126_v43 = vmul.f32 %v1122_v46, %v2301_v63 }
 0x78f   :  { %v1138_v27 = vld [vmem:[#allocation2 + $0x8] sm:$0xff] }
 0x790   :  { %1134 = vst.msk [vmem:[#allocation2 + $0x10] sm:$0xff] %vm218_vm3, %v1126_v43  ;;  %v1982_v39 = vpack.i.bf16 %v1126_v43, %v1125_v62  ;;  %v2009_v62 = vld [vmem:[%s2850_s6 + $0x3] ss:$0 sm:$0xff] }
 0x792   :  { %1983 = vrot.lane.b32.xlu1 %v1982_v39, %s2123_s23 }
 0x793   :  { %v1116_v26 = vpop.f32.mrf.mxu0 }
 0x794   :  { %v1117_v4 = vadd.f32 %v2008_v61, %v1116_v26 }
 0x796   :  { %v1123_v41 = vadd.f32 %v1117_v4, %v2548_v54  ;;  %v2656_v60 = vadd.f32 %v1117_v4, %v835_v47 }
 0x797   :  { %v1141_v8 = vld [vmem:[#allocation2 + $0x10] sm:$0xff] }
 0x798   :  { %v1127_v9 = vmul.f32 %v1123_v41, %v2314_v3  ;;  %v1987_v59 = vpack.i.bf16 %v1142_v40, %v1141_v8 }
 0x79a   :  { %1135 = vst.msk [vmem:[#allocation2 + $0x28] sm:$0xff] %vm218_vm3, %v1127_v9  ;;  %1988 = vrot.lane.b32.xlu2 %v1987_v59, %s2124_s24 }
 0x79b   :  { %v1118_v56 = vpop.f32.mrf.mxu0 }
 0x79c   :  { %v1119_v7 = vadd.f32 %v2008_v61, %v1118_v56 }
 0x79e   :  { %v1124_v10 = vadd.f32 %v1119_v7, %v2557_v6  ;;  %v2664_v5 = vadd.f32 %v1119_v7, %v836_v52  ;;  %v1893_v6 = vld [vmem:[%s2849_s5 + $0xa0] sm:$0xff] }
 0x7a0   :  { %v1128_v54 = vmul.f32 %v1124_v10, %v2322_v12 }
 0x7a1   :  { %v1140_v44 = vld [vmem:[#allocation2 + $0x28] sm:$0xff] }
 0x7a2   :  { %1136 = vst.msk [vmem:[#allocation2 + $0x30] sm:$0xff] %vm218_vm3, %v1128_v54  ;;  %1270 = vrot.lane.b32.xlu2 %v2285_v51, %s2124_s24  ;;  %v1992_v15 = vpack.i.bf16 %v1128_v54, %v1127_v9  ;;  %v1895_v51 = vld [vmem:[%s2849_s5 + $0xb0] sm:$0xff] }
 0x7a3   :  { %1250 = vmatpush.bf16.msra.mxu1 %v1895_v51 }
 0x7a4   :  { %1993 = vrot.lane.b32.xlu0 %v1992_v15, %s2123_s23 }
 0x7a7   :  { %1251 = vmatpush.bf16.msra.mxu1 %v1894_v1 }
 0x7a9   :  { %v1143_v14 = vld [vmem:[#allocation2 + $0x30] sm:$0xff] }
 0x7aa   :  { %1276 = vrot.lane.b32.xlu2 %v2610_v16, %s2124_s24  ;;  %v1997_v2 = vpack.i.bf16 %v1144_v11, %v1143_v14 }
 0x7ab   :  { %1252 = vmatpush.bf16.msra.mxu1 %v1893_v6 }
 0x7ac   :  { %1272 = vrot.lane.b32.xlu0 %v2291_v57, %s2124_s24  ;;  %1998 = vrot.lane.b32.xlu1 %v1997_v2, %s2124_s24  ;;  %v1892_v57 = vld [vmem:[%s2849_s5 + $0x98] sm:$0xff] }
 0x7af   :  { %1253 = vmatpush.bf16.msra.mxu1 %v1892_v57 }
 0x7b4   :  { %1274 = vrot.lane.b32.xlu1 %v2304_v0, %s2124_s24  ;;  %v1891_v0 = vld [vmem:[%s2849_s5 + $0x90] sm:$0xff] }
 0x7b5   :  { %1254 = vmatpush.bf16.msra.mxu1 %v1891_v0 }
 0x7f4   :  { %v1989_v16 = vpop.permute.xlu2 %1988 }
 0x7f5   :  { %v1991_v22 = vunpack.i.h.bf16 %v1989_v16  ;;  %v1990_v23 = vunpack.i.l.bf16 %v1989_v16 }
 0x7fc   :  { %v1271_v17 = vpop.permute.xlu2 %1270 }
 0x804   :  { %v1984_v19 = vpop.permute.xlu1 %1983 }
 0x805   :  { %v1986_v20 = vunpack.i.h.bf16 %v1984_v19  ;;  %v1985_v21 = vunpack.i.l.bf16 %v1984_v19 }
 0x807   :  { %v1177_v28 = vsel %vm218_vm3, %v1137_v18, %v1985_v21  ;;  %v1178_v49 = vsel %vm218_vm3, %v1138_v27, %v1986_v20  ;;  %v1277_v27 = vpop.permute.xlu2 %1276 }
 0x808   :  { %v1181_v42 = vsel %vm275_vm4, %v1177_v28, %v1990_v23  ;;  %v1182_v29 = vsel %vm275_vm4, %v1178_v49, %v1991_v22  ;;  %v1898_v23 = vld [vmem:[%s2853_s9 + $0x8] sm:$0xff] }
 0x809   :  { %v1185_v31 = vpack.c.bf16 %v1182_v29, %v1181_v42  ;;  %1420 = vmatpush.bf16.msra.mxu2 %v1898_v23 }
 0x80b   :  { %1844 = vmatmul.msk.bf16.vlgmr.msra.gmra.mxu1 %vm334_vm5, %v1185_v31 }
 0x816   :  { %v1994_v32 = vpop.permute.xlu0 %1993 }
 0x817   :  { %v1996_v33 = vunpack.i.h.bf16 %v1994_v32  ;;  %v1995_v34 = vunpack.i.l.bf16 %v1994_v32 }
 0x819   :  { %v1179_v61 = vsel %vm218_vm3, %v1139_v35, %v1995_v34  ;;  %v1180_v37 = vsel %vm218_vm3, %v1140_v44, %v1996_v33 }
 0x81e   :  { %v1999_v50 = vpop.permute.xlu1 %1998  ;;  %v1273_v47 = vpop.permute.xlu0 %1272 }
 0x81f   :  { %v2001_v36 = vunpack.i.h.bf16 %v1999_v50  ;;  %v2000_v55 = vunpack.i.l.bf16 %v1999_v50 }
 0x821   :  { %v1183_v38 = vsel %vm275_vm4, %v1179_v61, %v2000_v55  ;;  %v1184_v13 = vsel %vm275_vm4, %v1180_v37, %v2001_v36 }
 0x822   :  { %v1186_v24 = vpack.c.bf16 %v1184_v13, %v1183_v38 }
 0x824   :  { %1845 = vmatmul.msk.bf16.gmra.mxu1 %vm334_vm5, %v1186_v24 }
 0x826   :  { %v1275_v15 = vpop.permute.xlu1 %1274 }
 0x888   :  { %v1256_v48 = vpop.f32.mrf.mxu1 }
 0x889   :  { %v1257_v30 = vadd.f32 %v2009_v62, %v1256_v48 }
 0x88b   :  { %v2706_v46 = vadd.f32 %v1271_v17, %v1257_v30 }
 0x88d   :  { %v1846_v43 = vmul.f32 -1.442695, %v2706_v46 }
 0x88f   :  { %2084 = vpow2.f32 %v1846_v43 }
 0x890   :  { %v1258_v39 = vpop.f32.mrf.mxu1 }
 0x891   :  { %v1259_v26 = vadd.f32 %v2009_v62, %v1258_v39 }
 0x893   :  { %v2709_v4 = vadd.f32 %v1273_v47, %v1259_v26 }
 0x895   :  { %v2085_v45 = vpop.eup %2084  ;;  %v1847_v40 = vmul.f32 -1.442695, %v2709_v4 }
 0x896   :  { %v1302_v41 = vadd.f32 1.0, %v2085_v45 }
 0x897   :  { %2086 = vpow2.f32 %v1847_v40 }
 0x898   :  { %2088 = vrcp.f32 %v1302_v41  ;;  %v1317_v54 = vand.u32 2147483648, %v1302_v41  ;;  %v1315_v14 = vand.u32 2147483647, %v1302_v41  ;;  %vm1311_vm5 = vweird.f32 %v1302_v41 }
 0x89a   :  { %v1318_v57 = vor.u32 1.1754944e-38, %v1317_v54  ;;  %vm1316_vm7 = vcmp.eq.f32.partialorder %v1315_v14, 8.507059e+37 }
 0x89d   :  { %v2087_v8 = vpop.eup %2086 }
 0x89e   :  { %v2089_v9 = vpop.eup %2088  ;;  %v1303_v59 = vadd.f32 1.0, %v2087_v8 }
 0x89f   :  { %v1307_v56 = vmul.f32 %v2089_v9, %v1302_v41  ;;  %vm1312_vm4 = vweird.f32 %v2089_v9 }
 0x8a0   :  { %2090 = vrcp.f32 %v1303_v59  ;;  %vm1313_vm6 = vmor %vm1311_vm5, %vm1312_vm4  ;;  %v1332_v22 = vand.u32 2147483648, %v1303_v59  ;;  %v1330_v49 = vand.u32 2147483647, %v1303_v59  ;;  %vm1326_vm9 = vweird.f32 %v1303_v59 }
 0x8a1   :  { %v1261_v52 = vpop.f32.mrf.mxu1  ;;  %v1308_v7 = vsub.f32 1.0, %v1307_v56  ;;  %v1897_v56 = vld [vmem:[%s2853_s9] sm:$0xff] }
 0x8a2   :  { %v1262_v10 = vadd.f32 %v2009_v62, %v1261_v52  ;;  %v1333_v33 = vor.u32 1.1754944e-38, %v1332_v22  ;;  %vm1331_vm11 = vcmp.eq.f32.partialorder %v1330_v49, 8.507059e+37  ;;  %1421 = vmatpush.bf16.msra.mxu2 %v1897_v56 }
 0x8a3   :  { %v1309_v11 = vmul.f32 %v2089_v9, %v1308_v7 }
 0x8a4   :  { %v2712_v2 = vadd.f32 %v1275_v15, %v1262_v10 }
 0x8a5   :  { %v1310_v51 = vadd.f32 %v2089_v9, %v1309_v11 }
 0x8a6   :  { %v2091_v1 = vpop.eup %2090  ;;  %v1848_v6 = vmul.f32 -1.442695, %v2712_v2 }
 0x8a7   :  { %v1314_v0 = vsel %vm1313_vm6, %v2089_v9, %v1310_v51  ;;  %v1322_v16 = vmul.f32 %v2091_v1, %v1303_v59  ;;  %vm1327_vm8 = vweird.f32 %v2091_v1  ;;  %vm1623_vm6 = vcmask 1024  }
 0x8a8   :  { %2092 = vpow2.f32 %v1848_v6  ;;  %v1319_v18 = vsel %vm1316_vm7, %v1318_v57, %v1314_v0  ;;  %vm1328_vm10 = vmor %vm1326_vm9, %vm1327_vm8 }
 0x8a9   :  { %v1263_v19 = vpop.f32.mrf.mxu1  ;;  %1370 = vrot.lane.b32.xlu0 %v1319_v18, %s2125_s20  ;;  %v1323_v20 = vsub.f32 1.0, %v1322_v16  ;;  %v2010_v18 = vld [vmem:[%s2854_s10] ss:$0 sm:$0xff] }
 0x8aa   :  { %v1264_v21 = vadd.f32 %v2009_v62, %v1263_v19 }
 0x8ab   :  { %v1324_v28 = vmul.f32 %v2091_v1, %v1323_v20 }
 0x8ac   :  { %v1285_v42 = vadd.f32 %v1277_v27, %v1264_v21 }
 0x8ad   :  { %v1325_v29 = vadd.f32 %v2091_v1, %v1324_v28 }
 0x8ae   :  { %v2093_v31 = vpop.eup %2092  ;;  %v1849_v32 = vmul.f32 -1.442695, %v1285_v42 }
 0x8af   :  { %v1304_v34 = vadd.f32 1.0, %v2093_v31  ;;  %v1329_v35 = vsel %vm1328_vm10, %v2091_v1, %v1325_v29  ;;  %v1460_v29 = vld [vmem:[%s2855_s11 + $0x18] sm:$0xff]  ;;  %v1459_v31 = vld [vmem:[%s2855_s11 + $0x10] sm:$0xff] }
 0x8b0   :  { %2094 = vpow2.f32 %v1849_v32  ;;  %v1334_v50 = vsel %vm1331_vm11, %v1333_v33, %v1329_v35  ;;  %1497 = vmatpush.msrb.mxu0 %v1460_v29  ;;  %1899 = vmatpush.msra.mxu3 %v1460_v29  ;;  %v1458_v33 = vld [vmem:[%s2855_s11 + $0x8] sm:$0xff] }
 0x8b1   :  { %2096 = vrcp.f32 %v1304_v34  ;;  %1372 = vrot.lane.b32.xlu1 %v1334_v50, %s2125_s20  ;;  %v1347_v38 = vand.u32 2147483648, %v1304_v34  ;;  %v1345_v24 = vand.u32 2147483647, %v1304_v34  ;;  %vm1341_vm13 = vweird.f32 %v1304_v34 }
 0x8b2   :  { %1900 = vmatpush.msra.mxu3 %v1459_v31  ;;  %1498 = vmatpush.msrb.mxu0 %v1459_v31 }
 0x8b3   :  { %v1348_v30 = vor.u32 1.1754944e-38, %v1347_v38  ;;  %vm1346_vm15 = vcmp.eq.f32.partialorder %v1345_v24, 8.507059e+37 }
 0x8b4   :  { %1901 = vmatpush.msra.mxu3 %v1458_v33  ;;  %1499 = vmatpush.msrb.mxu0 %v1458_v33 }
 0x8b6   :  { %v2095_v44 = vpop.eup %2094 }
 0x8b7   :  { %v2097_v36 = vpop.eup %2096  ;;  %v1305_v55 = vadd.f32 1.0, %v2095_v44 }
 0x8b8   :  { %v1337_v61 = vmul.f32 %v2097_v36, %v1304_v34  ;;  %vm1342_vm12 = vweird.f32 %v2097_v36  ;;  %v1457_v34 = vld [vmem:[%s2855_s11] sm:$0xff] }
 0x8b9   :  { %2098 = vrcp.f32 %v1305_v55  ;;  %vm1343_vm14 = vmor %vm1341_vm13, %vm1342_vm12  ;;  %v1362_v47 = vand.u32 2147483648, %v1305_v55  ;;  %v1360_v40 = vand.u32 2147483647, %v1305_v55  ;;  %vm1356_vm2 = vweird.f32 %v1305_v55  ;;  %1902 = vmatpush.msra.mxu3 %v1457_v34  ;;  %1500 = vmatpush.msrb.mxu0 %v1457_v34 }
 0x8ba   :  { %v1338_v37 = vsub.f32 1.0, %v1337_v61  ;;  %2100 = vtanh.f32 %v2706_v46 }
 0x8bb   :  { %v1363_v8 = vor.u32 1.1754944e-38, %v1362_v47  ;;  %vm1361_vm5 = vcmp.eq.f32.partialorder %v1360_v40, 8.507059e+37  ;;  %2102 = vtanh.f32 %v2709_v4 }
 0x8bc   :  { %v1339_v13 = vmul.f32 %v2097_v36, %v1338_v37  ;;  %2104 = vtanh.f32 %v2712_v2 }
 0x8bd   :  { %2106 = vtanh.f32 %v1285_v42 }
 0x8be   :  { %v1340_v62 = vadd.f32 %v2097_v36, %v1339_v13 }
 0x8bf   :  { %v2099_v48 = vpop.eup %2098 }
 0x8c0   :  { %v1344_v17 = vsel %vm1343_vm14, %v2097_v36, %v1340_v62  ;;  %v1352_v43 = vmul.f32 %v2099_v48, %v1305_v55  ;;  %vm1357_vm0 = vweird.f32 %v2099_v48  ;;  %v2101_v7 = vpop.eup %2100 }
 0x8c1   :  { %v1349_v39 = vsel %vm1346_vm15, %v1348_v30, %v1344_v17  ;;  %vm1358_vm4 = vmor %vm1356_vm2, %vm1357_vm0  ;;  %v2103_v10 = vpop.eup %2102 }
 0x8c2   :  { %1374 = vrot.lane.b32.xlu2 %v1349_v39, %s2125_s20  ;;  %v1353_v26 = vsub.f32 1.0, %v1352_v43  ;;  %v2105_v1 = vpop.eup %2104 }
 0x8c3   :  { %v2107_v6 = vpop.eup %2106 }
 0x8c4   :  { %v1354_v45 = vmul.f32 %v2099_v48, %v1353_v26 }
 0x8c6   :  { %v1355_v41 = vadd.f32 %v2099_v48, %v1354_v45  ;;  %v2116_v45 = vld [vmem:[%s2847_s0] sm:$0xff] }
 0x8c7   :  { %1554 = vst.msk [vmem:[%s2857_s13] sm:$0xff] %vm95_vm1, %v2116_v45 }
 0x8c8   :  { %v1359_v9 = vsel %vm1358_vm4, %v2099_v48, %v1355_v41 }
 0x8c9   :  { %v1364_v59 = vsel %vm1361_vm5, %v1363_v8, %v1359_v9 }
 0x8ca   :  { %1376 = vrot.lane.b32.xlu0 %v1364_v59, %s2125_s20 }
 0x91b   :  { %v1371_v52 = vpop.permute.xlu0 %1370 }
 0x91c   :  { %v1382_v15 = vmul.f32 %v2101_v7, %v1371_v52  ;;  %v1375_v51 = vpop.permute.xlu2 %1374  ;;  %v2117_v52 = vld [vmem:[%s2847_s0 + $0x8] sm:$0xff] }
 0x91d   :  { %v1384_v0 = vmul.f32 %v2105_v1, %v1375_v51  ;;  %v2118_v1 = vld [vmem:[%s2847_s0 + $0x10] sm:$0xff]  ;;  %1555 = vst.msk [vmem:[%s2857_s13 + $0x8] sm:$0xff] %vm95_vm1, %v2117_v52 }
 0x91e   :  { %1556 = vst.msk [vmem:[%s2857_s13 + $0x10] sm:$0xff] %vm95_vm1, %v2118_v1 }
 0x923   :  { %v1373_v54 = vpop.permute.xlu1 %1372 }
 0x924   :  { %v1383_v11 = vmul.f32 %v2103_v10, %v1373_v54 }
 0x926   :  { %v1386_v14 = vpack.c.bf16 %v1383_v11, %v1382_v15 }
 0x928   :  { %1858 = vmatmul.msk.bf16.vlgmr.msra.gmra.mxu2 %vm218_vm3, %v1386_v14 }
 0x93c   :  { %v1377_v57 = vpop.permute.xlu0 %1376 }
 0x93d   :  { %v1385_v46 = vmul.f32 %v2107_v6, %v1377_v57 }
 0x93f   :  { %v1387_v16 = vpack.c.bf16 %v1385_v46, %v1384_v0  ;;  %v2119_v0 = vld [vmem:[%s2847_s0 + $0x18] sm:$0xff] }
 0x940   :  { %1557 = vst.msk [vmem:[%s2857_s13 + $0x18] sm:$0xff] %vm95_vm1, %v2119_v0 }
 0x941   :  { %1859 = vmatmul.msk.bf16.gmra.mxu2 %vm218_vm3, %v1387_v16 }
 0x9ab   :  { %v1423_v4 = vpop.f32.mrf.mxu2 }
 0x9ac   :  { %v1424_v2 = vadd.f32 %v2010_v18, %v1423_v4 }
 0x9b3   :  { %v1425_v19 = vpop.f32.mrf.mxu2 }
 0x9b4   :  { %v1426_v20 = vadd.f32 %v2010_v18, %v1425_v19 }
 0x9b6   :  { %1439 = vrot.lane.b32.xlu1 %v1426_v20, %s2123_s23 }
 0x9be   :  { %1437 = vrot.lane.b32.xlu1 %v1424_v2, %s2123_s23 }
 0x9c4   :  { %v1428_v21 = vpop.f32.mrf.mxu2 }
 0x9c5   :  { %v1429_v22 = vadd.f32 %v2010_v18, %v1428_v21 }
 0x9c7   :  { %1441 = vrot.lane.b32.xlu2 %v1429_v22, %s2123_s23 }
 0x9cc   :  { %v1430_v23 = vpop.f32.mrf.mxu2 }
 0x9cd   :  { %v1431_v27 = vadd.f32 %v2010_v18, %v1430_v23 }
 0x9cf   :  { %1443 = vrot.lane.b32.xlu0 %v1431_v27, %s2123_s23 }
 0xa21   :  { %v1442_v28 = vpop.permute.xlu2 %1441 }
 0xa22   :  { %v1451_v49 = vadd.f32 %v1442_v28, %v2656_v60 }
 0xa24   :  { %v1455_v42 = vmul.f32 %v1451_v49, %v2314_v3 }
 0xa26   :  { %1473 = vrot.lane.b32.xlu0 %v1455_v42, %s2125_s20 }
 0xa28   :  { %v1440_v32 = vpop.permute.xlu1 %1439 }
 0xa29   :  { %v1450_v60 = vadd.f32 %v1440_v32, %v2645_v58 }
 0xa2b   :  { %v1454_v35 = vmul.f32 %v1450_v60, %v2301_v63 }
 0xa2d   :  { %1471 = vrot.lane.b32.xlu2 %v1454_v35, %s2125_s20 }
 0xa30   :  { %v1438_v50 = vpop.permute.xlu1 %1437 }
 0xa31   :  { %v1449_v44 = vadd.f32 %v1438_v50, %v2638_v25 }
 0xa33   :  { %v1453_v36 = vmul.f32 %v1449_v44, %v2288_v53 }
 0xa35   :  { %1469 = vrot.lane.b32.xlu2 %v1453_v36, %s2125_s20 }
 0xa41   :  { %v1444_v58 = vpop.permute.xlu0 %1443 }
 0xa42   :  { %v1452_v55 = vadd.f32 %v1444_v58, %v2664_v5  ;;  %v2011_v5 = vld [vmem:[%s2856_s12] ss:$0 sm:$0xff] }
 0xa44   :  { %v1456_v61 = vmul.f32 %v1452_v55, %v2322_v12 }
 0xa46   :  { %1475 = vrot.lane.b32.xlu1 %v1456_v61, %s2125_s20  ;;  %s2126_s20 = smov 124  }
 0xa87   :  { %v1472_v37 = vpop.permute.xlu2 %1471 }
 0xa88   :  { %1861 = vmatmul.msk.f32.vlgmr.msra.gmra.mxu3 %vm218_vm3, %v1472_v37 }
 0xa8f   :  { %v1470_v38 = vpop.permute.xlu2 %1469 }
 0xa90   :  { %1860 = vmatmul.msk.f32.vlgmr.msrb.gmra.mxu0 %vm218_vm3, %v1470_v38 }
 0xa98   :  { %v1474_v13 = vpop.permute.xlu0 %1473 }
 0xa99   :  { %1862 = vmatmul.msk.f32.gmra.mxu3 %vm218_vm3, %v1474_v13 }
 0xab8   :  { %v1476_v25 = vpop.permute.xlu1 %1475 }
 0xab9   :  { %1863 = vmatmul.msk.f32.gmra.mxu3 %vm218_vm3, %v1476_v25  ;;  %vm1574_vm3 = vcmask 64544  }
 0xb0b   :  { %v1505_v24 = vpop.f32.mrf.mxu3 }
 0xb0c   :  { %v1506_v48 = vadd.f32 %v2011_v5, %v1505_v24 }
 0xb0d   :  { %v1502_v62 = vpop.f32.mrf.mxu0 }
 0xb0e   :  { %v1503_v30 = vadd.f32 %v2011_v5, %v1502_v62  ;;  %v1515_v43 = vmul.f32 %v1506_v48, %v2301_v63 }
 0xb10   :  { %v2769_v17 = vmul.f32 %v1503_v30, %v2288_v53  ;;  %v1520_v26 = vmul.f32 1.442695, %v1515_v43 }
 0xb12   :  { %v1518_v39 = vmul.f32 1.442695, %v2769_v17  ;;  %1583 = vrot.lane.b32.xlu0 %v2769_v17, %s2126_s20 }
 0xb14   :  { %2108 = vpow2.f32 %v1518_v39 }
 0xb15   :  { %2110 = vpow2.f32 %v1520_v26 }
 0xb1a   :  { %v2109_v47 = vpop.eup %2108 }
 0xb1b   :  { %v1526_v40 = vmul.f32 %v2116_v45, %v2109_v47  ;;  %v2111_v56 = vpop.eup %2110 }
 0xb1c   :  { %v1508_v41 = vpop.f32.mrf.mxu3  ;;  %v1527_v7 = vmul.f32 %v2117_v52, %v2111_v56 }
 0xb1d   :  { %v1509_v8 = vadd.f32 %v2011_v5, %v1508_v41  ;;  %v1530_v9 = vmul.f32 %v1526_v40, %v2288_v53 }
 0xb1e   :  { %v1531_v10 = vmul.f32 %v1527_v7, %v2301_v63 }
 0xb1f   :  { %v1516_v59 = vmul.f32 %v1509_v8, %v2314_v3  ;;  %1538 = vrot.lane.b32.xlu1 %v1530_v9, %s2126_s20 }
 0xb21   :  { %1587 = vrot.lane.b32.xlu2 %v1516_v59, %s2126_s20  ;;  %v1522_v54 = vmul.f32 1.442695, %v1516_v59 }
 0xb23   :  { %2112 = vpow2.f32 %v1522_v54 }
 0xb27   :  { %1585 = vrot.lane.b32.xlu1 %v1515_v43, %s2126_s20 }
 0xb29   :  { %1540 = vrot.lane.b32.xlu2 %v1531_v10, %s2126_s20  ;;  %v2113_v14 = vpop.eup %2112 }
 0xb2a   :  { %v1528_v6 = vmul.f32 %v2118_v1, %v2113_v14 }
 0xb2c   :  { %v1532_v63 = vmul.f32 %v1528_v6, %v2314_v3 }
 0xb3c   :  { %v1511_v53 = vpop.f32.mrf.mxu3 }
 0xb3d   :  { %v1512_v15 = vadd.f32 %v2011_v5, %v1511_v53 }
 0xb3f   :  { %v1517_v11 = vmul.f32 %v1512_v15, %v2322_v12 }
 0xb41   :  { %v1524_v51 = vmul.f32 1.442695, %v1517_v11  ;;  %1589 = vrot.lane.b32.xlu0 %v1517_v11, %s2126_s20 }
 0xb43   :  { %2114 = vpow2.f32 %v1524_v51 }
 0xb49   :  { %v2115_v57 = vpop.eup %2114  ;;  %1542 = vrot.lane.b32.xlu0 %v1532_v63, %s2126_s20 }
 0xb4a   :  { %v1529_v46 = vmul.f32 %v2119_v0, %v2115_v57 }
 0xb4c   :  { %v1533_v16 = vmul.f32 %v1529_v46, %v2322_v12 }
 0xb4e   :  { %1544 = vrot.lane.b32.xlu1 %v1533_v16, %s2126_s20 }
 0xb7b   :  { %v1588_v4 = vpop.permute.xlu2 %1587 }
 0xb7c   :  { %v1601_v18 = vsel %vm95_vm1, %v1588_v4, 0.0 }
 0xb7d   :  { %1602 = vadd.xlane.f32.xlu1 %v1601_v18 }
 0xb83   :  { %v1541_v12 = vpop.permute.xlu2 %1540 }
 0xb84   :  { %v1584_v19 = vpop.permute.xlu0 %1583  ;;  %v1551_v22 = vadd.f32 %v1541_v12, %v1515_v43 }
 0xb85   :  { %v1595_v20 = vsel %vm95_vm1, %v1584_v19, 0.0 }
 0xb86   :  { %1596 = vadd.xlane.f32.xlu2 %v1595_v20 }
 0xb91   :  { %v1539_v3 = vpop.permute.xlu1 %1538 }
 0xb92   :  { %v1550_v31 = vadd.f32 %v1539_v3, %v2769_v17 }
 0xb99   :  { %v1586_v2 = vpop.permute.xlu1 %1585 }
 0xb9a   :  { %v1598_v21 = vsel %vm95_vm1, %v1586_v2, 0.0 }
 0xb9b   :  { %1599 = vadd.xlane.f32.xlu0 %v1598_v21 }
 0xbaf   :  { %1564 = vrot.lane.b32.xlu0 %v1551_v22, %s2120_s21 }
 0xbb3   :  { %v1590_v23 = vpop.permute.xlu0 %1589 }
 0xbb4   :  { %v1604_v27 = vsel %vm95_vm1, %v1590_v23, 0.0  ;;  %vm1621_vm1 = vcmask 1040384  }
 0xbb5   :  { %1605 = vadd.xlane.f32.xlu2 %v1604_v27 }
 0xbbb   :  { %v1543_v28 = vpop.permute.xlu0 %1542 }
 0xbbc   :  { %v1552_v49 = vadd.f32 %v1543_v28, %v1516_v59 }
 0xbbe   :  { %1566 = vrot.lane.b32.xlu1 %v1552_v49, %s2120_s21 }
 0xbc0   :  { %v1545_v42 = vpop.permute.xlu1 %1544 }
 0xbc1   :  { %v1553_v29 = vadd.f32 %v1545_v42, %v1517_v11 }
 0xbc3   :  { %1568 = vrot.lane.b32.xlu0 %v1553_v29, %s2120_s21 }
 0xbcd   :  { %1562 = vrot.lane.b32.xlu2 %v1550_v31, %s2120_s21 }
 0xbf0   :  { %v1603_v44 = vpop.xlane.xlu1 %1602 }
 0xbf9   :  { %v1597_v33 = vpop.xlane.xlu2 %1596 }
 0xc0e   :  { %v1600_v32 = vpop.xlane.xlu0 %1599 }
 0xc0f   :  { %v1607_v60 = vadd.f32 %v1600_v32, %v1597_v33 }
 0xc11   :  { %v1608_v34 = vrot.slane %v1607_v60, 4 }
 0xc13   :  { %v1609_v50 = vadd.f32 %v1608_v34, %v1607_v60 }
 0xc15   :  { %v1610_v58 = vrot.slane %v1609_v50, 2 }
 0xc17   :  { %v1611_v37 = vadd.f32 %v1610_v58, %v1609_v50 }
 0xc19   :  { %v1612_v24 = vrot.slane %v1611_v37, 1 }
 0xc1b   :  { %v1613_v30 = vadd.f32 %v1612_v24, %v1611_v37 }
 0xc21   :  { %v1565_v35 = vpop.permute.xlu0 %1564 }
 0xc22   :  { %1576 = vst.msk [vmem:[%s2857_s13 + $0x8] sm:$0xff] %vm1574_vm3, %v1565_v35 }
 0xc28   :  { %v1606_v36 = vpop.xlane.xlu2 %1605 }
 0xc29   :  { %v1614_v55 = vadd.f32 %v1606_v36, %v1603_v44 }
 0xc2b   :  { %v1615_v61 = vrot.slane %v1614_v55, 4 }
 0xc2d   :  { %v1616_v38 = vadd.f32 %v1615_v61, %v1614_v55 }
 0xc2f   :  { %v1617_v13 = vrot.slane %v1616_v38, 2 }
 0xc30   :  { %v1563_v25 = vpop.permute.xlu2 %1562  ;;  %v1567_v5 = vpop.permute.xlu1 %1566 }
 0xc31   :  { %v1618_v62 = vadd.f32 %v1617_v13, %v1616_v38  ;;  %1575 = vst.msk [vmem:[%s2857_s13] sm:$0xff] %vm1574_vm3, %v1563_v25 }
 0xc32   :  { %1577 = vst.msk [vmem:[%s2857_s13 + $0x10] sm:$0xff] %vm1574_vm3, %v1567_v5 }
 0xc33   :  { %v1619_v48 = vrot.slane %v1618_v62, 1 }
 0xc35   :  { %v1620_v17 = vadd.f32 %v1619_v48, %v1618_v62  ;;  %v1569_v43 = vpop.permute.xlu0 %1568 }
 0xc36   :  { %1578 = vst.msk [vmem:[%s2857_s13 + $0x18] sm:$0xff] %vm1574_vm3, %v1569_v43 }
 0xc37   :  { %v1622_v39 = vsel %vm1621_vm1, %v1613_v30, %v1620_v17 }
 0xc38   :  { %1624 = vst.msk [vmem:[%s2858_s14] sm:$0x3] %vm1623_vm6, %v1622_v39 }

</bundles_post_ra>
